<compile_context>
chip_gen: v7x
topology: tpu7x:2x2x1
jax: 0.10.0
libtpu: 0.0.40
codegen_flags: <defaults>
</compile_context>

<pallas_src>
import functools

import jax
import jax.numpy as jnp
from jax import lax
from jax.experimental import pallas as pl
from jax.experimental.pallas import tpu as pltpu

NEG_SLOPE = 0.2
DILATIONS = (1, 3, 5)


def _round_up(x, m):
    return (x + m - 1) // m * m


def _leaky(x):
    return jnp.where(x > 0, x, NEG_SLOPE * x)


def _tree3_kernel(x_ref, wp_ref, bp_ref, wcat_ref, bcat_ref, wf_ref, bf_ref,
                  o1_ref, o3_ref, o5_ref, of_ref,
                  xpad_ref, slab_ref, feat_ref,
                  *, H, W, marg, dils, Cin_p, Cout_p, Cout, BB):
    # x_ref:    (BB, Cin_p, HW)          BB images, pixels on lanes (Cin zero-padded to 8)
    # wp_ref:   (3, Cout_p, 9*Cin_p)     per-path 3x3 weights (tap-major, ch-minor)
    # bp_ref:   (3, Cout_p, 1)
    # wcat_ref: (2*Cout_p, 3*Cout_p)     fused cat1_3 + cat3_5 1x1 weights (zero-padded)
    # bcat_ref: (2*Cout_p, 1)
    # wf_ref:   (Cout_p, 2*Cout_p)       final 1x1 weights
    # bf_ref:   (Cout_p, 1)
    # o*_ref:   (BB, Cout, HW)
    # xpad_ref: (BB*Cin_p, HW + 2*marg)  zero-haloed flattened copy of x (images on sublanes)
    # slab_ref: (9*Cin_p, BB*HW)         im2col slab (rebuilt per path)
    # feat_ref: (3*Cout_p, BB*HW)        contiguous [p1 | p3 | p5] features
    HW = H * W

    # ---- stage x into the zero-haloed, lane-flattened buffer -----------------
    zeros_halo = jnp.zeros((BB * Cin_p, marg), jnp.float32)
    xpad_ref[:, 0:marg] = zeros_halo
    xpad_ref[:, marg + HW:marg + HW + marg] = zeros_halo
    for bb in range(BB):
        xpad_ref[bb * Cin_p:(bb + 1) * Cin_p, marg:marg + HW] = x_ref[bb]

    # hoisted column index of every pixel (masks W-direction wrap of shifted reads)
    col = lax.broadcasted_iota(jnp.int32, (Cin_p, HW), 1) % W

    out_path_refs = (o1_ref, o3_ref, o5_ref)
    for p, d in enumerate(dils):
        # per-dilation masks, hoisted out of the tap loops
        mask_l = col >= d
        mask_r = col < (W - d)

        # ---- build the im2col slab (9*Cin_p, BB*HW) for dilation d -----------
        for ky in range(3):
            for kx in range(3):
                dy, dx = ky - 1, kx - 1
                start = marg + (dy * W + dx) * d          # static lane offset
                k = ky * 3 + kx
                for bb in range(BB):
                    tap = xpad_ref[bb * Cin_p:(bb + 1) * Cin_p, start:start + HW]
                    if dx < 0:
                        tap = jnp.where(mask_l, tap, 0.0)
                    elif dx > 0:
                        tap = jnp.where(mask_r, tap, 0.0)
                    slab_ref[k * Cin_p:(k + 1) * Cin_p, bb * HW:(bb + 1) * HW] = tap

        # ---- one fused MXU matmul per path: (Cout_p, 9*Cin_p) @ (9*Cin_p, N) --
        f = jnp.dot(wp_ref[p], slab_ref[...],
                    preferred_element_type=jnp.float32) + bp_ref[p]
        f = _leaky(f)
        feat_ref[p * Cout_p:(p + 1) * Cout_p, :] = f
        o_ref = out_path_refs[p]
        for bb in range(BB):
            o_ref[bb] = f[0:Cout, bb * HW:(bb + 1) * HW].astype(o_ref.dtype)

    # ---- fused 1x1 "cat" convs: 2 matmuls total, no materialized concat ------
    catb = _leaky(jnp.dot(wcat_ref[...], feat_ref[...],
                          preferred_element_type=jnp.float32) + bcat_ref[...])
    fin = jnp.dot(wf_ref[...], catb,
                  preferred_element_type=jnp.float32) + bf_ref[...]
    for bb in range(BB):
        of_ref[bb] = fin[0:Cout, bb * HW:(bb + 1) * HW].astype(of_ref.dtype)


def tree3_pallas(x_nchw, w1, b1, w3, b3, w5, b5,
                 wc13, bc13, wc35, bc35, wcf, bcf,
                 dils=DILATIONS, batch_block=None):
    B, Cin, H, W = x_nchw.shape
    Cout = w1.shape[0]
    HW = H * W
    Cin_p = _round_up(Cin, 8)
    Cout_p = _round_up(Cout, 8)
    P = max(dils)
    marg = _round_up(P * W + P, 128)            # halo width, lane-aligned

    # --- choose how many images to process per grid step (VMEM-budgeted) -----
    if batch_block is None:
        budget = 12 * 2**20
        batch_block = 1
        for bb in range(B, 0, -1):
            if B % bb:
                continue
            n = bb * HW
            scratch = 4 * (bb * Cin_p * (HW + 2 * marg) + 9 * Cin_p * n + 3 * Cout_p * n)
            io = 4 * 2 * (bb * Cin_p * HW + 4 * bb * Cout * HW)
            if scratch + io <= budget:
                batch_block = bb
                break
    assert B % batch_block == 0, (B, batch_block)
    BB = batch_block
    N = BB * HW

    f32 = jnp.float32

    # --- inputs: pixels-on-lanes, channels zero-padded to a multiple of 8 -----
    x = x_nchw.reshape(B, Cin, HW).astype(f32)
    if Cin_p != Cin:
        x = jnp.pad(x, ((0, 0), (0, Cin_p - Cin), (0, 0)))

    def prep_path_w(w):  # torch (Cout, Cin, 3, 3) -> (Cout_p, 9*Cin_p), tap-major ch-minor
        w = jnp.transpose(w.astype(f32), (0, 2, 3, 1))                # (Cout,3,3,Cin)
        w = jnp.pad(w, ((0, Cout_p - Cout), (0, 0), (0, 0), (0, Cin_p - Cin)))
        return w.reshape(Cout_p, 9 * Cin_p)

    def prep_bias(b):
        return jnp.pad(b.astype(f32), (0, Cout_p - Cout)).reshape(Cout_p, 1)

    wp = jnp.stack([prep_path_w(w1), prep_path_w(w3), prep_path_w(w5)])
    bp = jnp.stack([prep_bias(b1), prep_bias(b3), prep_bias(b5)])

    # fused cat1_3 + cat3_5 weight over the [p1 | p3 | p5] feature slab
    # rows [0:Cout] -> cat1_3, rows [Cout_p:Cout_p+Cout] -> cat3_5
    wcat = jnp.zeros((2 * Cout_p, 3 * Cout_p), f32)
    wcat = wcat.at[0:Cout, 0:Cout].set(wc13[:, 0:Cout].astype(f32))
    wcat = wcat.at[0:Cout, Cout_p:Cout_p + Cout].set(wc13[:, Cout:2 * Cout].astype(f32))
    wcat = wcat.at[Cout_p:Cout_p + Cout, Cout_p:Cout_p + Cout].set(wc35[:, 0:Cout].astype(f32))
    wcat = wcat.at[Cout_p:Cout_p + Cout, 2 * Cout_p:2 * Cout_p + Cout].set(
        wc35[:, Cout:2 * Cout].astype(f32))
    bcat = jnp.zeros((2 * Cout_p, 1), f32)
    bcat = bcat.at[0:Cout, 0].set(bc13.astype(f32))
    bcat = bcat.at[Cout_p:Cout_p + Cout, 0].set(bc35.astype(f32))

    wf = jnp.zeros((Cout_p, 2 * Cout_p), f32)
    wf = wf.at[0:Cout, 0:Cout].set(wcf[:, 0:Cout].astype(f32))
    wf = wf.at[0:Cout, Cout_p:Cout_p + Cout].set(wcf[:, Cout:2 * Cout].astype(f32))
    bf = prep_bias(bcf)

    kernel = functools.partial(
        _tree3_kernel, H=H, W=W, marg=marg, dils=dils,
        Cin_p=Cin_p, Cout_p=Cout_p, Cout=Cout, BB=BB)

    flops = int(B * HW * (3 * 2 * Cout_p * 9 * Cin_p
                          + 2 * (2 * Cout_p) * (3 * Cout_p)
                          + 2 * Cout_p * (2 * Cout_p)))
    bytes_accessed = int(4 * (x.size + 4 * B * Cout * HW + wp.size + bp.size
                              + wcat.size + bcat.size + wf.size + bf.size))

    scratch_bytes = 4 * (BB * Cin_p * (HW + 2 * marg) + 9 * Cin_p * N + 3 * Cout_p * N)
    block_bytes = 4 * (BB * Cin_p * HW + 4 * BB * Cout * HW
                       + wp.size + bp.size + wcat.size + bcat.size + wf.size + bf.size)
    vmem_limit = int(min(64 * 2**20, max(16 * 2**20, 4 * (scratch_bytes + block_bytes))))

    out_sds = jax.ShapeDtypeStruct((B, Cout, HW), jnp.float32)
    out_spec = pl.BlockSpec((BB, Cout, HW), lambda b: (b, 0, 0))

    outs = pl.pallas_call(
        kernel,
        out_shape=(out_sds, out_sds, out_sds, out_sds),
        grid_spec=pltpu.PrefetchScalarGridSpec(
            num_scalar_prefetch=0,
            grid=(B // BB,),
            in_specs=[
                pl.BlockSpec((BB, Cin_p, HW), lambda b: (b, 0, 0)),
                pl.BlockSpec((3, Cout_p, 9 * Cin_p), lambda b: (0, 0, 0)),
                pl.BlockSpec((3, Cout_p, 1), lambda b: (0, 0, 0)),
                pl.BlockSpec((2 * Cout_p, 3 * Cout_p), lambda b: (0, 0)),
                pl.BlockSpec((2 * Cout_p, 1), lambda b: (0, 0)),
                pl.BlockSpec((Cout_p, 2 * Cout_p), lambda b: (0, 0)),
                pl.BlockSpec((Cout_p, 1), lambda b: (0, 0)),
            ],
            out_specs=(out_spec, out_spec, out_spec, out_spec),
            scratch_shapes=[
                pltpu.VMEM((BB * Cin_p, HW + 2 * marg), jnp.float32),  # zero-haloed flat x
                pltpu.VMEM((9 * Cin_p, N), jnp.float32),               # im2col slab
                pltpu.VMEM((3 * Cout_p, N), jnp.float32),              # [p1|p3|p5] features
            ],
        ),
        compiler_params=pltpu.CompilerParams(
            dimension_semantics=("parallel",),
            vmem_limit_bytes=vmem_limit),
        cost_estimate=pl.CostEstimate(flops=flops, transcendentals=0,
                                      bytes_accessed=bytes_accessed),
    )(x, wp, bp, wcat, bcat, wf, bf)

    return tuple(o.reshape(B, Cout, H, W) for o in outs)


def tree3_reference(x, w1, b1, w3, b3, w5, b5,
                    wc13, bc13, wc35, bc35, wcf, bcf, dils=DILATIONS):
    """Pure-JAX reference for correctness checking."""
    x = x.astype(jnp.float32)

    def conv3(w, b, d):
        y = lax.conv_general_dilated(
            x, w.astype(jnp.float32), window_strides=(1, 1),
            padding=((d, d), (d, d)), rhs_dilation=(d, d),
            dimension_numbers=('NCHW', 'OIHW', 'NCHW'))
        return _leaky(y + b[None, :, None, None])

    p1 = conv3(w1, b1, dils[0])
    p3 = conv3(w3, b3, dils[1])
    p5 = conv3(w5, b5, dils[2])

    def cat1x1(a, bfeat, w, bias, act):
        cat = jnp.concatenate([a, bfeat], axis=1)
        y = jnp.einsum('ok,bkhw->bohw', w.astype(jnp.float32), cat)
        y = y + bias[None, :, None, None]
        return _leaky(y) if act else y

    c13 = cat1x1(p1, p3, wc13, bc13, True)
    c35 = cat1x1(p3, p5, wc35, bc35, True)
    fin = cat1x1(c13, c35, wcf, bcf, False)
    return p1, p3, p5, fin


if __name__ == "__main__":
    key = jax.random.PRNGKey(0)
    ks = jax.random.split(key, 13)

    B, Cin, Cout, H, W = 2, 4, 8, 16, 16
    x = jax.random.normal(ks[0], (B, Cin, H, W), jnp.float32)         # NCHW, like PyTorch
    # Deterministic synthetic parameters (shapes implied by the module __init__):
    w1 = jax.random.normal(ks[1], (Cout, Cin, 3, 3), jnp.float32) * 0.1
    b1 = jax.random.normal(ks[2], (Cout,), jnp.float32) * 0.1
    w3 = jax.random.normal(ks[3], (Cout, Cin, 3, 3), jnp.float32) * 0.1
    b3 = jax.random.normal(ks[4], (Cout,), jnp.float32) * 0.1
    w5 = jax.random.normal(ks[5], (Cout, Cin, 3, 3), jnp.float32) * 0.1
    b5 = jax.random.normal(ks[6], (Cout,), jnp.float32) * 0.1
    wc13 = jax.random.normal(ks[7], (Cout, 2 * Cout), jnp.float32) * 0.1
    bc13 = jax.random.normal(ks[8], (Cout,), jnp.float32) * 0.1
    wc35 = jax.random.normal(ks[9], (Cout, 2 * Cout), jnp.float32) * 0.1
    bc35 = jax.random.normal(ks[10], (Cout,), jnp.float32) * 0.1
    wcf = jax.random.normal(ks[11], (Cout, 2 * Cout), jnp.float32) * 0.1
    bcf = jax.random.normal(ks[12], (Cout,), jnp.float32) * 0.1

    args = (x, w1, b1, w3, b3, w5, b5, wc13, bc13, wc35, bc35, wcf, bcf)

    outs = jax.block_until_ready(tree3_pallas(*args))
    refs = tree3_reference(*args)

    for name, o, r in zip(("path1", "path3", "path5", "final"), outs, refs):
        assert o.shape == (B, Cout, H, W), (name, o.shape)
        max_err = float(jnp.max(jnp.abs(o - r)))
        assert jnp.allclose(o, r, atol=1e-3, rtol=1e-3), (name, max_err)
    print("KERNEL_OK")
</pallas_src>

<mosaic_0001>
module attributes {stable_mosaic.version = 11 : i64} {
  func.func @_tree3_kernel(%arg0: i32, %arg1: memref<2x8x256xf32, #tpu.memory_space<vmem>>, %arg2: memref<3x8x72xf32, #tpu.memory_space<vmem>>, %arg3: memref<3x8x1xf32, #tpu.memory_space<vmem>>, %arg4: memref<16x24xf32, #tpu.memory_space<vmem>>, %arg5: memref<16x1xf32, #tpu.memory_space<vmem>>, %arg6: memref<8x16xf32, #tpu.memory_space<vmem>>, %arg7: memref<8x1xf32, #tpu.memory_space<vmem>>, %arg8: memref<2x8x256xf32, #tpu.memory_space<vmem>>, %arg9: memref<2x8x256xf32, #tpu.memory_space<vmem>>, %arg10: memref<2x8x256xf32, #tpu.memory_space<vmem>>, %arg11: memref<2x8x256xf32, #tpu.memory_space<vmem>>, %arg12: memref<16x512xf32, #tpu.memory_space<vmem>>, %arg13: memref<72x512xf32, #tpu.memory_space<vmem>>, %arg14: memref<24x512xf32, #tpu.memory_space<vmem>>) attributes {dimension_semantics = [#tpu.dimension_semantics<parallel>], iteration_bounds = array<i64: 1>, scalar_prefetch = 0 : i64, scratch_operands = 3 : i64, tpu.core_type = #tpu.core_type<tc>, window_params = [{transform_indices = @transform_0, window_bounds = array<i64: 2, 8, 256>}, {pipeline_mode = #tpu.pipeline_mode<synchronous>, transform_indices = @transform_1, window_bounds = array<i64: 3, 8, 72>}, {pipeline_mode = #tpu.pipeline_mode<synchronous>, transform_indices = @transform_2, window_bounds = array<i64: 3, 8, 1>}, {pipeline_mode = #tpu.pipeline_mode<synchronous>, transform_indices = @transform_3, window_bounds = array<i64: 16, 24>}, {pipeline_mode = #tpu.pipeline_mode<synchronous>, transform_indices = @transform_4, window_bounds = array<i64: 16, 1>}, {pipeline_mode = #tpu.pipeline_mode<synchronous>, transform_indices = @transform_5, window_bounds = array<i64: 8, 16>}, {pipeline_mode = #tpu.pipeline_mode<synchronous>, transform_indices = @transform_6, window_bounds = array<i64: 8, 1>}, {transform_indices = @transform_7, window_bounds = array<i64: 2, 8, 256>}, {transform_indices = @transform_8, window_bounds = array<i64: 2, 8, 256>}, {transform_indices = @transform_9, window_bounds = array<i64: 2, 8, 256>}, {transform_indices = @transform_10, window_bounds = array<i64: 2, 8, 256>}]} {
    %cst = arith.constant 0.000000e+00 : f32
    %0 = vector.broadcast %cst : f32 to vector<16x128xf32>
    %c0 = arith.constant 0 : index
    %c0_0 = arith.constant 0 : index
    %1 = vector.load %arg12[%c0, %c0_0] : memref<16x512xf32, #tpu.memory_space<vmem>>, vector<16x128xf32>
    tpu.vector_store %arg12[%c0, %c0_0], %0 {strides = array<i32>} : memref<16x512xf32, #tpu.memory_space<vmem>>, vector<16x128xf32>,
    %c0_1 = arith.constant 0 : index
    %c384 = arith.constant 384 : index
    %2 = vector.load %arg12[%c0_1, %c384] : memref<16x512xf32, #tpu.memory_space<vmem>>, vector<16x128xf32>
    tpu.vector_store %arg12[%c0_1, %c384], %0 {strides = array<i32>} : memref<16x512xf32, #tpu.memory_space<vmem>>, vector<16x128xf32>,
    %c0_2 = arith.constant 0 : index
    %c0_3 = arith.constant 0 : index
    %c0_4 = arith.constant 0 : index
    %3 = vector.load %arg1[%c0_2, %c0_3, %c0_4] : memref<2x8x256xf32, #tpu.memory_space<vmem>>, vector<1x8x256xf32>
    %4 = vector.shape_cast %3 : vector<1x8x256xf32> to vector<8x256xf32>
    %c0_5 = arith.constant 0 : index
    %c128 = arith.constant 128 : index
    %5 = vector.load %arg12[%c0_5, %c128] : memref<16x512xf32, #tpu.memory_space<vmem>>, vector<8x256xf32>
    tpu.vector_store %arg12[%c0_5, %c128], %4 {strides = array<i32>} : memref<16x512xf32, #tpu.memory_space<vmem>>, vector<8x256xf32>,
    %c1 = arith.constant 1 : index
    %c0_6 = arith.constant 0 : index
    %c0_7 = arith.constant 0 : index
    %6 = vector.load %arg1[%c1, %c0_6, %c0_7] : memref<2x8x256xf32, #tpu.memory_space<vmem>>, vector<1x8x256xf32>
    %7 = vector.shape_cast %6 : vector<1x8x256xf32> to vector<8x256xf32>
    %c8 = arith.constant 8 : index
    %c128_8 = arith.constant 128 : index
    %8 = vector.load %arg12[%c8, %c128_8] : memref<16x512xf32, #tpu.memory_space<vmem>>, vector<8x256xf32>
    tpu.vector_store %arg12[%c8, %c128_8], %7 {strides = array<i32>} : memref<16x512xf32, #tpu.memory_space<vmem>>, vector<8x256xf32>,
    %9 = tpu.iota {dimensions = array<i32: 1>} : vector<8x256xi32>
    %c16_i32 = arith.constant 16 : i32
    %c0_i32 = arith.constant 0 : i32
    %10 = arith.cmpi eq, %c16_i32, %c0_i32 : i32
    %c1_i32 = arith.constant 1 : i32
    %11 = arith.select %10, %c1_i32, %c16_i32 : i32
    %12 = vector.broadcast %11 : i32 to vector<8x256xi32>
    %13 = arith.remsi %9, %12 : vector<8x256xi32>
    %c0_i32_9 = arith.constant 0 : i32
    %14 = vector.broadcast %c0_i32_9 : i32 to vector<8x256xi32>
    %15 = arith.cmpi ne, %13, %14 : vector<8x256xi32>
    %c0_i32_10 = arith.constant 0 : i32
    %16 = vector.broadcast %c0_i32_10 : i32 to vector<8x256xi32>
    %17 = arith.cmpi slt, %13, %16 : vector<8x256xi32>
    %c0_i32_11 = arith.constant 0 : i32
    %18 = arith.cmpi slt, %11, %c0_i32_11 : i32
    %19 = vector.broadcast %18 : i1 to vector<8x256xi1>
    %20 = vector.broadcast %19 : vector<8x256xi1> to vector<8x256xi1>
    %21 = arith.xori %17, %20 : vector<8x256xi1>
    %22 = arith.andi %21, %15 : vector<8x256xi1>
    %23 = vector.broadcast %11 : i32 to vector<8x256xi32>
    %24 = arith.addi %13, %23 : vector<8x256xi32>
    %25 = arith.select %22, %24, %13 : vector<8x256xi1>, vector<8x256xi32>
    %c1_i32_12 = arith.constant 1 : i32
    %26 = vector.broadcast %c1_i32_12 : i32 to vector<8x256xi32>
    %27 = arith.cmpi sge, %25, %26 : vector<8x256xi32>
    %c15_i32 = arith.constant 15 : i32
    %28 = vector.broadcast %c15_i32 : i32 to vector<8x256xi32>
    %29 = arith.cmpi slt, %25, %28 : vector<8x256xi32>
    %c0_13 = arith.constant 0 : index
    %c111 = arith.constant 111 : index
    %30 = vector.load %arg12[%c0_13, %c111] : memref<16x512xf32, #tpu.memory_space<vmem>>, vector<8x256xf32>
    %cst_14 = arith.constant 0.000000e+00 : f32
    %31 = vector.broadcast %cst_14 : f32 to vector<8x256xf32>
    %32 = arith.select %27, %30, %31 : vector<8x256xi1>, vector<8x256xf32>
    %c0_15 = arith.constant 0 : index
    %c0_16 = arith.constant 0 : index
    %33 = vector.load %arg13[%c0_15, %c0_16] : memref<72x512xf32, #tpu.memory_space<vmem>>, vector<8x256xf32>
    tpu.vector_store %arg13[%c0_15, %c0_16], %32 {strides = array<i32>} : memref<72x512xf32, #tpu.memory_space<vmem>>, vector<8x256xf32>,
    %c8_17 = arith.constant 8 : index
    %c111_18 = arith.constant 111 : index
    %34 = vector.load %arg12[%c8_17, %c111_18] : memref<16x512xf32, #tpu.memory_space<vmem>>, vector<8x256xf32>
    %cst_19 = arith.constant 0.000000e+00 : f32
    %35 = vector.broadcast %cst_19 : f32 to vector<8x256xf32>
    %36 = arith.select %27, %34, %35 : vector<8x256xi1>, vector<8x256xf32>
    %c0_20 = arith.constant 0 : index
    %c256 = arith.constant 256 : index
    %37 = vector.load %arg13[%c0_20, %c256] : memref<72x512xf32, #tpu.memory_space<vmem>>, vector<8x256xf32>
    tpu.vector_store %arg13[%c0_20, %c256], %36 {strides = array<i32>} : memref<72x512xf32, #tpu.memory_space<vmem>>, vector<8x256xf32>,
    %c0_21 = arith.constant 0 : index
    %c112 = arith.constant 112 : index
    %38 = vector.load %arg12[%c0_21, %c112] : memref<16x512xf32, #tpu.memory_space<vmem>>, vector<8x256xf32>
    %c8_22 = arith.constant 8 : index
    %c0_23 = arith.constant 0 : index
    %39 = vector.load %arg13[%c8_22, %c0_23] : memref<72x512xf32, #tpu.memory_space<vmem>>, vector<8x256xf32>
    tpu.vector_store %arg13[%c8_22, %c0_23], %38 {strides = array<i32>} : memref<72x512xf32, #tpu.memory_space<vmem>>, vector<8x256xf32>,
    %c8_24 = arith.constant 8 : index
    %c112_25 = arith.constant 112 : index
    %40 = vector.load %arg12[%c8_24, %c112_25] : memref<16x512xf32, #tpu.memory_space<vmem>>, vector<8x256xf32>
    %c8_26 = arith.constant 8 : index
    %c256_27 = arith.constant 256 : index
    %41 = vector.load %arg13[%c8_26, %c256_27] : memref<72x512xf32, #tpu.memory_space<vmem>>, vector<8x256xf32>
    tpu.vector_store %arg13[%c8_26, %c256_27], %40 {strides = array<i32>} : memref<72x512xf32, #tpu.memory_space<vmem>>, vector<8x256xf32>,
    %c0_28 = arith.constant 0 : index
    %c113 = arith.constant 113 : index
    %42 = vector.load %arg12[%c0_28, %c113] : memref<16x512xf32, #tpu.memory_space<vmem>>, vector<8x256xf32>
    %cst_29 = arith.constant 0.000000e+00 : f32
    %43 = vector.broadcast %cst_29 : f32 to vector<8x256xf32>
    %44 = arith.select %29, %42, %43 : vector<8x256xi1>, vector<8x256xf32>
    %c16 = arith.constant 16 : index
    %c0_30 = arith.constant 0 : index
    %45 = vector.load %arg13[%c16, %c0_30] : memref<72x512xf32, #tpu.memory_space<vmem>>, vector<8x256xf32>
    tpu.vector_store %arg13[%c16, %c0_30], %44 {strides = array<i32>} : memref<72x512xf32, #tpu.memory_space<vmem>>, vector<8x256xf32>,
    %c8_31 = arith.constant 8 : index
    %c113_32 = arith.constant 113 : index
    %46 = vector.load %arg12[%c8_31, %c113_32] : memref<16x512xf32, #tpu.memory_space<vmem>>, vector<8x256xf32>
    %cst_33 = arith.constant 0.000000e+00 : f32
    %47 = vector.broadcast %cst_33 : f32 to vector<8x256xf32>
    %48 = arith.select %29, %46, %47 : vector<8x256xi1>, vector<8x256xf32>
    %c16_34 = arith.constant 16 : index
    %c256_35 = arith.constant 256 : index
    %49 = vector.load %arg13[%c16_34, %c256_35] : memref<72x512xf32, #tpu.memory_space<vmem>>, vector<8x256xf32>
    tpu.vector_store %arg13[%c16_34, %c256_35], %48 {strides = array<i32>} : memref<72x512xf32, #tpu.memory_space<vmem>>, vector<8x256xf32>,
    %c0_36 = arith.constant 0 : index
    %c127 = arith.constant 127 : index
    %50 = vector.load %arg12[%c0_36, %c127] : memref<16x512xf32, #tpu.memory_space<vmem>>, vector<8x256xf32>
    %cst_37 = arith.constant 0.000000e+00 : f32
    %51 = vector.broadcast %cst_37 : f32 to vector<8x256xf32>
    %52 = arith.select %27, %50, %51 : vector<8x256xi1>, vector<8x256xf32>
    %c24 = arith.constant 24 : index
    %c0_38 = arith.constant 0 : index
    %53 = vector.load %arg13[%c24, %c0_38] : memref<72x512xf32, #tpu.memory_space<vmem>>, vector<8x256xf32>
    tpu.vector_store %arg13[%c24, %c0_38], %52 {strides = array<i32>} : memref<72x512xf32, #tpu.memory_space<vmem>>, vector<8x256xf32>,
    %c8_39 = arith.constant 8 : index
    %c127_40 = arith.constant 127 : index
    %54 = vector.load %arg12[%c8_39, %c127_40] : memref<16x512xf32, #tpu.memory_space<vmem>>, vector<8x256xf32>
    %cst_41 = arith.constant 0.000000e+00 : f32
    %55 = vector.broadcast %cst_41 : f32 to vector<8x256xf32>
    %56 = arith.select %27, %54, %55 : vector<8x256xi1>, vector<8x256xf32>
    %c24_42 = arith.constant 24 : index
    %c256_43 = arith.constant 256 : index
    %57 = vector.load %arg13[%c24_42, %c256_43] : memref<72x512xf32, #tpu.memory_space<vmem>>, vector<8x256xf32>
    tpu.vector_store %arg13[%c24_42, %c256_43], %56 {strides = array<i32>} : memref<72x512xf32, #tpu.memory_space<vmem>>, vector<8x256xf32>,
    %c0_44 = arith.constant 0 : index
    %c128_45 = arith.constant 128 : index
    %58 = vector.load %arg12[%c0_44, %c128_45] : memref<16x512xf32, #tpu.memory_space<vmem>>, vector<8x256xf32>
    %c32 = arith.constant 32 : index
    %c0_46 = arith.constant 0 : index
    %59 = vector.load %arg13[%c32, %c0_46] : memref<72x512xf32, #tpu.memory_space<vmem>>, vector<8x256xf32>
    tpu.vector_store %arg13[%c32, %c0_46], %58 {strides = array<i32>} : memref<72x512xf32, #tpu.memory_space<vmem>>, vector<8x256xf32>,
    %c8_47 = arith.constant 8 : index
    %c128_48 = arith.constant 128 : index
    %60 = vector.load %arg12[%c8_47, %c128_48] : memref<16x512xf32, #tpu.memory_space<vmem>>, vector<8x256xf32>
    %c32_49 = arith.constant 32 : index
    %c256_50 = arith.constant 256 : index
    %61 = vector.load %arg13[%c32_49, %c256_50] : memref<72x512xf32, #tpu.memory_space<vmem>>, vector<8x256xf32>
    tpu.vector_store %arg13[%c32_49, %c256_50], %60 {strides = array<i32>} : memref<72x512xf32, #tpu.memory_space<vmem>>, vector<8x256xf32>,
    %c0_51 = arith.constant 0 : index
    %c129 = arith.constant 129 : index
    %62 = vector.load %arg12[%c0_51, %c129] : memref<16x512xf32, #tpu.memory_space<vmem>>, vector<8x256xf32>
    %cst_52 = arith.constant 0.000000e+00 : f32
    %63 = vector.broadcast %cst_52 : f32 to vector<8x256xf32>
    %64 = arith.select %29, %62, %63 : vector<8x256xi1>, vector<8x256xf32>
    %c40 = arith.constant 40 : index
    %c0_53 = arith.constant 0 : index
    %65 = vector.load %arg13[%c40, %c0_53] : memref<72x512xf32, #tpu.memory_space<vmem>>, vector<8x256xf32>
    tpu.vector_store %arg13[%c40, %c0_53], %64 {strides = array<i32>} : memref<72x512xf32, #tpu.memory_space<vmem>>, vector<8x256xf32>,
    %c8_54 = arith.constant 8 : index
    %c129_55 = arith.constant 129 : index
    %66 = vector.load %arg12[%c8_54, %c129_55] : memref<16x512xf32, #tpu.memory_space<vmem>>, vector<8x256xf32>
    %cst_56 = arith.constant 0.000000e+00 : f32
    %67 = vector.broadcast %cst_56 : f32 to vector<8x256xf32>
    %68 = arith.select %29, %66, %67 : vector<8x256xi1>, vector<8x256xf32>
    %c40_57 = arith.constant 40 : index
    %c256_58 = arith.constant 256 : index
    %69 = vector.load %arg13[%c40_57, %c256_58] : memref<72x512xf32, #tpu.memory_space<vmem>>, vector<8x256xf32>
    tpu.vector_store %arg13[%c40_57, %c256_58], %68 {strides = array<i32>} : memref<72x512xf32, #tpu.memory_space<vmem>>, vector<8x256xf32>,
    %c0_59 = arith.constant 0 : index
    %c143 = arith.constant 143 : index
    %70 = vector.load %arg12[%c0_59, %c143] : memref<16x512xf32, #tpu.memory_space<vmem>>, vector<8x256xf32>
    %cst_60 = arith.constant 0.000000e+00 : f32
    %71 = vector.broadcast %cst_60 : f32 to vector<8x256xf32>
    %72 = arith.select %27, %70, %71 : vector<8x256xi1>, vector<8x256xf32>
    %c48 = arith.constant 48 : index
    %c0_61 = arith.constant 0 : index
    %73 = vector.load %arg13[%c48, %c0_61] : memref<72x512xf32, #tpu.memory_space<vmem>>, vector<8x256xf32>
    tpu.vector_store %arg13[%c48, %c0_61], %72 {strides = array<i32>} : memref<72x512xf32, #tpu.memory_space<vmem>>, vector<8x256xf32>,
    %c8_62 = arith.constant 8 : index
    %c143_63 = arith.constant 143 : index
    %74 = vector.load %arg12[%c8_62, %c143_63] : memref<16x512xf32, #tpu.memory_space<vmem>>, vector<8x256xf32>
    %cst_64 = arith.constant 0.000000e+00 : f32
    %75 = vector.broadcast %cst_64 : f32 to vector<8x256xf32>
    %76 = arith.select %27, %74, %75 : vector<8x256xi1>, vector<8x256xf32>
    %c48_65 = arith.constant 48 : index
    %c256_66 = arith.constant 256 : index
    %77 = vector.load %arg13[%c48_65, %c256_66] : memref<72x512xf32, #tpu.memory_space<vmem>>, vector<8x256xf32>
    tpu.vector_store %arg13[%c48_65, %c256_66], %76 {strides = array<i32>} : memref<72x512xf32, #tpu.memory_space<vmem>>, vector<8x256xf32>,
    %c0_67 = arith.constant 0 : index
    %c144 = arith.constant 144 : index
    %78 = vector.load %arg12[%c0_67, %c144] : memref<16x512xf32, #tpu.memory_space<vmem>>, vector<8x256xf32>
    %c56 = arith.constant 56 : index
    %c0_68 = arith.constant 0 : index
    %79 = vector.load %arg13[%c56, %c0_68] : memref<72x512xf32, #tpu.memory_space<vmem>>, vector<8x256xf32>
    tpu.vector_store %arg13[%c56, %c0_68], %78 {strides = array<i32>} : memref<72x512xf32, #tpu.memory_space<vmem>>, vector<8x256xf32>,
    %c8_69 = arith.constant 8 : index
    %c144_70 = arith.constant 144 : index
    %80 = vector.load %arg12[%c8_69, %c144_70] : memref<16x512xf32, #tpu.memory_space<vmem>>, vector<8x256xf32>
    %c56_71 = arith.constant 56 : index
    %c256_72 = arith.constant 256 : index
    %81 = vector.load %arg13[%c56_71, %c256_72] : memref<72x512xf32, #tpu.memory_space<vmem>>, vector<8x256xf32>
    tpu.vector_store %arg13[%c56_71, %c256_72], %80 {strides = array<i32>} : memref<72x512xf32, #tpu.memory_space<vmem>>, vector<8x256xf32>,
    %c0_73 = arith.constant 0 : index
    %c145 = arith.constant 145 : index
    %82 = vector.load %arg12[%c0_73, %c145] : memref<16x512xf32, #tpu.memory_space<vmem>>, vector<8x256xf32>
    %cst_74 = arith.constant 0.000000e+00 : f32
    %83 = vector.broadcast %cst_74 : f32 to vector<8x256xf32>
    %84 = arith.select %29, %82, %83 : vector<8x256xi1>, vector<8x256xf32>
    %c64 = arith.constant 64 : index
    %c0_75 = arith.constant 0 : index
    %85 = vector.load %arg13[%c64, %c0_75] : memref<72x512xf32, #tpu.memory_space<vmem>>, vector<8x256xf32>
    tpu.vector_store %arg13[%c64, %c0_75], %84 {strides = array<i32>} : memref<72x512xf32, #tpu.memory_space<vmem>>, vector<8x256xf32>,
    %c8_76 = arith.constant 8 : index
    %c145_77 = arith.constant 145 : index
    %86 = vector.load %arg12[%c8_76, %c145_77] : memref<16x512xf32, #tpu.memory_space<vmem>>, vector<8x256xf32>
    %cst_78 = arith.constant 0.000000e+00 : f32
    %87 = vector.broadcast %cst_78 : f32 to vector<8x256xf32>
    %88 = arith.select %29, %86, %87 : vector<8x256xi1>, vector<8x256xf32>
    %c64_79 = arith.constant 64 : index
    %c256_80 = arith.constant 256 : index
    %89 = vector.load %arg13[%c64_79, %c256_80] : memref<72x512xf32, #tpu.memory_space<vmem>>, vector<8x256xf32>
    tpu.vector_store %arg13[%c64_79, %c256_80], %88 {strides = array<i32>} : memref<72x512xf32, #tpu.memory_space<vmem>>, vector<8x256xf32>,
    %c0_81 = arith.constant 0 : index
    %c0_82 = arith.constant 0 : index
    %c0_83 = arith.constant 0 : index
    %90 = vector.load %arg2[%c0_81, %c0_82, %c0_83] : memref<3x8x72xf32, #tpu.memory_space<vmem>>, vector<1x8x72xf32>
    %91 = vector.shape_cast %90 : vector<1x8x72xf32> to vector<8x72xf32>
    %c0_84 = arith.constant 0 : index
    %c0_85 = arith.constant 0 : index
    %92 = vector.load %arg13[%c0_84, %c0_85] : memref<72x512xf32, #tpu.memory_space<vmem>>, vector<72x512xf32>
    %cst_86 = arith.constant dense<0.000000e+00> : vector<8x512xf32>
    %93 = tpu.matmul %91, %92, %cst_86 {dimension_numbers = #tpu.dot_dimension_numbers<[1], [0], [0], [1], [0, 0, 1, 1], [], []>} : vector<8x72xf32>, vector<72x512xf32>, vector<8x512xf32> -> vector<8x512xf32>
    %c0_87 = arith.constant 0 : index
    %c0_88 = arith.constant 0 : index
    %c0_89 = arith.constant 0 : index
    %94 = vector.load %arg3[%c0_87, %c0_88, %c0_89] : memref<3x8x1xf32, #tpu.memory_space<vmem>>, vector<1x8x1xf32>
    %95 = vector.shape_cast %94 : vector<1x8x1xf32> to vector<8x1xf32>
    %96 = vector.broadcast %95 : vector<8x1xf32> to vector<8x512xf32>
    %97 = arith.addf %93, %96 : vector<8x512xf32>
    %cst_90 = arith.constant 0.000000e+00 : f32
    %98 = vector.broadcast %cst_90 : f32 to vector<8x512xf32>
    %99 = arith.cmpf ogt, %97, %98 : vector<8x512xf32>
    %cst_91 = arith.constant 2.000000e-01 : f32
    %100 = vector.broadcast %cst_91 : f32 to vector<8x512xf32>
    %101 = arith.mulf %100, %97 : vector<8x512xf32>
    %102 = arith.select %99, %97, %101 : vector<8x512xi1>, vector<8x512xf32>
    %c0_92 = arith.constant 0 : index
    %c0_93 = arith.constant 0 : index
    %103 = vector.load %arg14[%c0_92, %c0_93] : memref<24x512xf32, #tpu.memory_space<vmem>>, vector<8x512xf32>
    tpu.vector_store %arg14[%c0_92, %c0_93], %102 {strides = array<i32>} : memref<24x512xf32, #tpu.memory_space<vmem>>, vector<8x512xf32>,
    %104 = vector.extract_strided_slice %102 {offsets = [0, 0], sizes = [8, 256], strides = [1, 1]} : vector<8x512xf32> to vector<8x256xf32>
    %c0_94 = arith.constant 0 : index
    %c0_95 = arith.constant 0 : index
    %c0_96 = arith.constant 0 : index
    %105 = vector.load %arg8[%c0_94, %c0_95, %c0_96] : memref<2x8x256xf32, #tpu.memory_space<vmem>>, vector<1x8x256xf32>
    %106 = vector.shape_cast %105 : vector<1x8x256xf32> to vector<8x256xf32>
    %107 = vector.shape_cast %104 : vector<8x256xf32> to vector<1x8x256xf32>
    tpu.vector_store %arg8[%c0_94, %c0_95, %c0_96], %107 {strides = array<i32>} : memref<2x8x256xf32, #tpu.memory_space<vmem>>, vector<1x8x256xf32>,
    %108 = vector.extract_strided_slice %102 {offsets = [0, 256], sizes = [8, 256], strides = [1, 1]} : vector<8x512xf32> to vector<8x256xf32>
    %c1_97 = arith.constant 1 : index
    %c0_98 = arith.constant 0 : index
    %c0_99 = arith.constant 0 : index
    %109 = vector.load %arg8[%c1_97, %c0_98, %c0_99] : memref<2x8x256xf32, #tpu.memory_space<vmem>>, vector<1x8x256xf32>
    %110 = vector.shape_cast %109 : vector<1x8x256xf32> to vector<8x256xf32>
    %111 = vector.shape_cast %108 : vector<8x256xf32> to vector<1x8x256xf32>
    tpu.vector_store %arg8[%c1_97, %c0_98, %c0_99], %111 {strides = array<i32>} : memref<2x8x256xf32, #tpu.memory_space<vmem>>, vector<1x8x256xf32>,
    %c3_i32 = arith.constant 3 : i32
    %112 = vector.broadcast %c3_i32 : i32 to vector<8x256xi32>
    %113 = arith.cmpi sge, %25, %112 : vector<8x256xi32>
    %c13_i32 = arith.constant 13 : i32
    %114 = vector.broadcast %c13_i32 : i32 to vector<8x256xi32>
    %115 = arith.cmpi slt, %25, %114 : vector<8x256xi32>
    %c0_100 = arith.constant 0 : index
    %c77 = arith.constant 77 : index
    %116 = vector.load %arg12[%c0_100, %c77] : memref<16x512xf32, #tpu.memory_space<vmem>>, vector<8x256xf32>
    %cst_101 = arith.constant 0.000000e+00 : f32
    %117 = vector.broadcast %cst_101 : f32 to vector<8x256xf32>
    %118 = arith.select %113, %116, %117 : vector<8x256xi1>, vector<8x256xf32>
    %c0_102 = arith.constant 0 : index
    %c0_103 = arith.constant 0 : index
    %119 = vector.load %arg13[%c0_102, %c0_103] : memref<72x512xf32, #tpu.memory_space<vmem>>, vector<8x256xf32>
    tpu.vector_store %arg13[%c0_102, %c0_103], %118 {strides = array<i32>} : memref<72x512xf32, #tpu.memory_space<vmem>>, vector<8x256xf32>,
    %c8_104 = arith.constant 8 : index
    %c77_105 = arith.constant 77 : index
    %120 = vector.load %arg12[%c8_104, %c77_105] : memref<16x512xf32, #tpu.memory_space<vmem>>, vector<8x256xf32>
    %cst_106 = arith.constant 0.000000e+00 : f32
    %121 = vector.broadcast %cst_106 : f32 to vector<8x256xf32>
    %122 = arith.select %113, %120, %121 : vector<8x256xi1>, vector<8x256xf32>
    %c0_107 = arith.constant 0 : index
    %c256_108 = arith.constant 256 : index
    %123 = vector.load %arg13[%c0_107, %c256_108] : memref<72x512xf32, #tpu.memory_space<vmem>>, vector<8x256xf32>
    tpu.vector_store %arg13[%c0_107, %c256_108], %122 {strides = array<i32>} : memref<72x512xf32, #tpu.memory_space<vmem>>, vector<8x256xf32>,
    %c0_109 = arith.constant 0 : index
    %c80 = arith.constant 80 : index
    %124 = vector.load %arg12[%c0_109, %c80] : memref<16x512xf32, #tpu.memory_space<vmem>>, vector<8x256xf32>
    %c8_110 = arith.constant 8 : index
    %c0_111 = arith.constant 0 : index
    %125 = vector.load %arg13[%c8_110, %c0_111] : memref<72x512xf32, #tpu.memory_space<vmem>>, vector<8x256xf32>
    tpu.vector_store %arg13[%c8_110, %c0_111], %124 {strides = array<i32>} : memref<72x512xf32, #tpu.memory_space<vmem>>, vector<8x256xf32>,
    %c8_112 = arith.constant 8 : index
    %c80_113 = arith.constant 80 : index
    %126 = vector.load %arg12[%c8_112, %c80_113] : memref<16x512xf32, #tpu.memory_space<vmem>>, vector<8x256xf32>
    %c8_114 = arith.constant 8 : index
    %c256_115 = arith.constant 256 : index
    %127 = vector.load %arg13[%c8_114, %c256_115] : memref<72x512xf32, #tpu.memory_space<vmem>>, vector<8x256xf32>
    tpu.vector_store %arg13[%c8_114, %c256_115], %126 {strides = array<i32>} : memref<72x512xf32, #tpu.memory_space<vmem>>, vector<8x256xf32>,
    %c0_116 = arith.constant 0 : index
    %c83 = arith.constant 83 : index
    %128 = vector.load %arg12[%c0_116, %c83] : memref<16x512xf32, #tpu.memory_space<vmem>>, vector<8x256xf32>
    %cst_117 = arith.constant 0.000000e+00 : f32
    %129 = vector.broadcast %cst_117 : f32 to vector<8x256xf32>
    %130 = arith.select %115, %128, %129 : vector<8x256xi1>, vector<8x256xf32>
    %c16_118 = arith.constant 16 : index
    %c0_119 = arith.constant 0 : index
    %131 = vector.load %arg13[%c16_118, %c0_119] : memref<72x512xf32, #tpu.memory_space<vmem>>, vector<8x256xf32>
    tpu.vector_store %arg13[%c16_118, %c0_119], %130 {strides = array<i32>} : memref<72x512xf32, #tpu.memory_space<vmem>>, vector<8x256xf32>,
    %c8_120 = arith.constant 8 : index
    %c83_121 = arith.constant 83 : index
    %132 = vector.load %arg12[%c8_120, %c83_121] : memref<16x512xf32, #tpu.memory_space<vmem>>, vector<8x256xf32>
    %cst_122 = arith.constant 0.000000e+00 : f32
    %133 = vector.broadcast %cst_122 : f32 to vector<8x256xf32>
    %134 = arith.select %115, %132, %133 : vector<8x256xi1>, vector<8x256xf32>
    %c16_123 = arith.constant 16 : index
    %c256_124 = arith.constant 256 : index
    %135 = vector.load %arg13[%c16_123, %c256_124] : memref<72x512xf32, #tpu.memory_space<vmem>>, vector<8x256xf32>
    tpu.vector_store %arg13[%c16_123, %c256_124], %134 {strides = array<i32>} : memref<72x512xf32, #tpu.memory_space<vmem>>, vector<8x256xf32>,
    %c0_125 = arith.constant 0 : index
    %c125 = arith.constant 125 : index
    %136 = vector.load %arg12[%c0_125, %c125] : memref<16x512xf32, #tpu.memory_space<vmem>>, vector<8x256xf32>
    %cst_126 = arith.constant 0.000000e+00 : f32
    %137 = vector.broadcast %cst_126 : f32 to vector<8x256xf32>
    %138 = arith.select %113, %136, %137 : vector<8x256xi1>, vector<8x256xf32>
    %c24_127 = arith.constant 24 : index
    %c0_128 = arith.constant 0 : index
    %139 = vector.load %arg13[%c24_127, %c0_128] : memref<72x512xf32, #tpu.memory_space<vmem>>, vector<8x256xf32>
    tpu.vector_store %arg13[%c24_127, %c0_128], %138 {strides = array<i32>} : memref<72x512xf32, #tpu.memory_space<vmem>>, vector<8x256xf32>,
    %c8_129 = arith.constant 8 : index
    %c125_130 = arith.constant 125 : index
    %140 = vector.load %arg12[%c8_129, %c125_130] : memref<16x512xf32, #tpu.memory_space<vmem>>, vector<8x256xf32>
    %cst_131 = arith.constant 0.000000e+00 : f32
    %141 = vector.broadcast %cst_131 : f32 to vector<8x256xf32>
    %142 = arith.select %113, %140, %141 : vector<8x256xi1>, vector<8x256xf32>
    %c24_132 = arith.constant 24 : index
    %c256_133 = arith.constant 256 : index
    %143 = vector.load %arg13[%c24_132, %c256_133] : memref<72x512xf32, #tpu.memory_space<vmem>>, vector<8x256xf32>
    tpu.vector_store %arg13[%c24_132, %c256_133], %142 {strides = array<i32>} : memref<72x512xf32, #tpu.memory_space<vmem>>, vector<8x256xf32>,
    %c0_134 = arith.constant 0 : index
    %c128_135 = arith.constant 128 : index
    %144 = vector.load %arg12[%c0_134, %c128_135] : memref<16x512xf32, #tpu.memory_space<vmem>>, vector<8x256xf32>
    %c32_136 = arith.constant 32 : index
    %c0_137 = arith.constant 0 : index
    %145 = vector.load %arg13[%c32_136, %c0_137] : memref<72x512xf32, #tpu.memory_space<vmem>>, vector<8x256xf32>
    tpu.vector_store %arg13[%c32_136, %c0_137], %144 {strides = array<i32>} : memref<72x512xf32, #tpu.memory_space<vmem>>, vector<8x256xf32>,
    %c8_138 = arith.constant 8 : index
    %c128_139 = arith.constant 128 : index
    %146 = vector.load %arg12[%c8_138, %c128_139] : memref<16x512xf32, #tpu.memory_space<vmem>>, vector<8x256xf32>
    %c32_140 = arith.constant 32 : index
    %c256_141 = arith.constant 256 : index
    %147 = vector.load %arg13[%c32_140, %c256_141] : memref<72x512xf32, #tpu.memory_space<vmem>>, vector<8x256xf32>
    tpu.vector_store %arg13[%c32_140, %c256_141], %146 {strides = array<i32>} : memref<72x512xf32, #tpu.memory_space<vmem>>, vector<8x256xf32>,
    %c0_142 = arith.constant 0 : index
    %c131 = arith.constant 131 : index
    %148 = vector.load %arg12[%c0_142, %c131] : memref<16x512xf32, #tpu.memory_space<vmem>>, vector<8x256xf32>
    %cst_143 = arith.constant 0.000000e+00 : f32
    %149 = vector.broadcast %cst_143 : f32 to vector<8x256xf32>
    %150 = arith.select %115, %148, %149 : vector<8x256xi1>, vector<8x256xf32>
    %c40_144 = arith.constant 40 : index
    %c0_145 = arith.constant 0 : index
    %151 = vector.load %arg13[%c40_144, %c0_145] : memref<72x512xf32, #tpu.memory_space<vmem>>, vector<8x256xf32>
    tpu.vector_store %arg13[%c40_144, %c0_145], %150 {strides = array<i32>} : memref<72x512xf32, #tpu.memory_space<vmem>>, vector<8x256xf32>,
    %c8_146 = arith.constant 8 : index
    %c131_147 = arith.constant 131 : index
    %152 = vector.load %arg12[%c8_146, %c131_147] : memref<16x512xf32, #tpu.memory_space<vmem>>, vector<8x256xf32>
    %cst_148 = arith.constant 0.000000e+00 : f32
    %153 = vector.broadcast %cst_148 : f32 to vector<8x256xf32>
    %154 = arith.select %115, %152, %153 : vector<8x256xi1>, vector<8x256xf32>
    %c40_149 = arith.constant 40 : index
    %c256_150 = arith.constant 256 : index
    %155 = vector.load %arg13[%c40_149, %c256_150] : memref<72x512xf32, #tpu.memory_space<vmem>>, vector<8x256xf32>
    tpu.vector_store %arg13[%c40_149, %c256_150], %154 {strides = array<i32>} : memref<72x512xf32, #tpu.memory_space<vmem>>, vector<8x256xf32>,
    %c0_151 = arith.constant 0 : index
    %c173 = arith.constant 173 : index
    %156 = vector.load %arg12[%c0_151, %c173] : memref<16x512xf32, #tpu.memory_space<vmem>>, vector<8x256xf32>
    %cst_152 = arith.constant 0.000000e+00 : f32
    %157 = vector.broadcast %cst_152 : f32 to vector<8x256xf32>
    %158 = arith.select %113, %156, %157 : vector<8x256xi1>, vector<8x256xf32>
    %c48_153 = arith.constant 48 : index
    %c0_154 = arith.constant 0 : index
    %159 = vector.load %arg13[%c48_153, %c0_154] : memref<72x512xf32, #tpu.memory_space<vmem>>, vector<8x256xf32>
    tpu.vector_store %arg13[%c48_153, %c0_154], %158 {strides = array<i32>} : memref<72x512xf32, #tpu.memory_space<vmem>>, vector<8x256xf32>,
    %c8_155 = arith.constant 8 : index
    %c173_156 = arith.constant 173 : index
    %160 = vector.load %arg12[%c8_155, %c173_156] : memref<16x512xf32, #tpu.memory_space<vmem>>, vector<8x256xf32>
    %cst_157 = arith.constant 0.000000e+00 : f32
    %161 = vector.broadcast %cst_157 : f32 to vector<8x256xf32>
    %162 = arith.select %113, %160, %161 : vector<8x256xi1>, vector<8x256xf32>
    %c48_158 = arith.constant 48 : index
    %c256_159 = arith.constant 256 : index
    %163 = vector.load %arg13[%c48_158, %c256_159] : memref<72x512xf32, #tpu.memory_space<vmem>>, vector<8x256xf32>
    tpu.vector_store %arg13[%c48_158, %c256_159], %162 {strides = array<i32>} : memref<72x512xf32, #tpu.memory_space<vmem>>, vector<8x256xf32>,
    %c0_160 = arith.constant 0 : index
    %c176 = arith.constant 176 : index
    %164 = vector.load %arg12[%c0_160, %c176] : memref<16x512xf32, #tpu.memory_space<vmem>>, vector<8x256xf32>
    %c56_161 = arith.constant 56 : index
    %c0_162 = arith.constant 0 : index
    %165 = vector.load %arg13[%c56_161, %c0_162] : memref<72x512xf32, #tpu.memory_space<vmem>>, vector<8x256xf32>
    tpu.vector_store %arg13[%c56_161, %c0_162], %164 {strides = array<i32>} : memref<72x512xf32, #tpu.memory_space<vmem>>, vector<8x256xf32>,
    %c8_163 = arith.constant 8 : index
    %c176_164 = arith.constant 176 : index
    %166 = vector.load %arg12[%c8_163, %c176_164] : memref<16x512xf32, #tpu.memory_space<vmem>>, vector<8x256xf32>
    %c56_165 = arith.constant 56 : index
    %c256_166 = arith.constant 256 : index
    %167 = vector.load %arg13[%c56_165, %c256_166] : memref<72x512xf32, #tpu.memory_space<vmem>>, vector<8x256xf32>
    tpu.vector_store %arg13[%c56_165, %c256_166], %166 {strides = array<i32>} : memref<72x512xf32, #tpu.memory_space<vmem>>, vector<8x256xf32>,
    %c0_167 = arith.constant 0 : index
    %c179 = arith.constant 179 : index
    %168 = vector.load %arg12[%c0_167, %c179] : memref<16x512xf32, #tpu.memory_space<vmem>>, vector<8x256xf32>
    %cst_168 = arith.constant 0.000000e+00 : f32
    %169 = vector.broadcast %cst_168 : f32 to vector<8x256xf32>
    %170 = arith.select %115, %168, %169 : vector<8x256xi1>, vector<8x256xf32>
    %c64_169 = arith.constant 64 : index
    %c0_170 = arith.constant 0 : index
    %171 = vector.load %arg13[%c64_169, %c0_170] : memref<72x512xf32, #tpu.memory_space<vmem>>, vector<8x256xf32>
    tpu.vector_store %arg13[%c64_169, %c0_170], %170 {strides = array<i32>} : memref<72x512xf32, #tpu.memory_space<vmem>>, vector<8x256xf32>,
    %c8_171 = arith.constant 8 : index
    %c179_172 = arith.constant 179 : index
    %172 = vector.load %arg12[%c8_171, %c179_172] : memref<16x512xf32, #tpu.memory_space<vmem>>, vector<8x256xf32>
    %cst_173 = arith.constant 0.000000e+00 : f32
    %173 = vector.broadcast %cst_173 : f32 to vector<8x256xf32>
    %174 = arith.select %115, %172, %173 : vector<8x256xi1>, vector<8x256xf32>
    %c64_174 = arith.constant 64 : index
    %c256_175 = arith.constant 256 : index
    %175 = vector.load %arg13[%c64_174, %c256_175] : memref<72x512xf32, #tpu.memory_space<vmem>>, vector<8x256xf32>
    tpu.vector_store %arg13[%c64_174, %c256_175], %174 {strides = array<i32>} : memref<72x512xf32, #tpu.memory_space<vmem>>, vector<8x256xf32>,
    %c1_176 = arith.constant 1 : index
    %c0_177 = arith.constant 0 : index
    %c0_178 = arith.constant 0 : index
    %176 = vector.load %arg2[%c1_176, %c0_177, %c0_178] : memref<3x8x72xf32, #tpu.memory_space<vmem>>, vector<1x8x72xf32>
    %177 = vector.shape_cast %176 : vector<1x8x72xf32> to vector<8x72xf32>
    %c0_179 = arith.constant 0 : index
    %c0_180 = arith.constant 0 : index
    %178 = vector.load %arg13[%c0_179, %c0_180] : memref<72x512xf32, #tpu.memory_space<vmem>>, vector<72x512xf32>
    %cst_181 = arith.constant dense<0.000000e+00> : vector<8x512xf32>
    %179 = tpu.matmul %177, %178, %cst_181 {dimension_numbers = #tpu.dot_dimension_numbers<[1], [0], [0], [1], [0, 0, 1, 1], [], []>} : vector<8x72xf32>, vector<72x512xf32>, vector<8x512xf32> -> vector<8x512xf32>
    %c1_182 = arith.constant 1 : index
    %c0_183 = arith.constant 0 : index
    %c0_184 = arith.constant 0 : index
    %180 = vector.load %arg3[%c1_182, %c0_183, %c0_184] : memref<3x8x1xf32, #tpu.memory_space<vmem>>, vector<1x8x1xf32>
    %181 = vector.shape_cast %180 : vector<1x8x1xf32> to vector<8x1xf32>
    %182 = vector.broadcast %181 : vector<8x1xf32> to vector<8x512xf32>
    %183 = arith.addf %179, %182 : vector<8x512xf32>
    %cst_185 = arith.constant 0.000000e+00 : f32
    %184 = vector.broadcast %cst_185 : f32 to vector<8x512xf32>
    %185 = arith.cmpf ogt, %183, %184 : vector<8x512xf32>
    %cst_186 = arith.constant 2.000000e-01 : f32
    %186 = vector.broadcast %cst_186 : f32 to vector<8x512xf32>
    %187 = arith.mulf %186, %183 : vector<8x512xf32>
    %188 = arith.select %185, %183, %187 : vector<8x512xi1>, vector<8x512xf32>
    %c8_187 = arith.constant 8 : index
    %c0_188 = arith.constant 0 : index
    %189 = vector.load %arg14[%c8_187, %c0_188] : memref<24x512xf32, #tpu.memory_space<vmem>>, vector<8x512xf32>
    tpu.vector_store %arg14[%c8_187, %c0_188], %188 {strides = array<i32>} : memref<24x512xf32, #tpu.memory_space<vmem>>, vector<8x512xf32>,
    %190 = vector.extract_strided_slice %188 {offsets = [0, 0], sizes = [8, 256], strides = [1, 1]} : vector<8x512xf32> to vector<8x256xf32>
    %c0_189 = arith.constant 0 : index
    %c0_190 = arith.constant 0 : index
    %c0_191 = arith.constant 0 : index
    %191 = vector.load %arg9[%c0_189, %c0_190, %c0_191] : memref<2x8x256xf32, #tpu.memory_space<vmem>>, vector<1x8x256xf32>
    %192 = vector.shape_cast %191 : vector<1x8x256xf32> to vector<8x256xf32>
    %193 = vector.shape_cast %190 : vector<8x256xf32> to vector<1x8x256xf32>
    tpu.vector_store %arg9[%c0_189, %c0_190, %c0_191], %193 {strides = array<i32>} : memref<2x8x256xf32, #tpu.memory_space<vmem>>, vector<1x8x256xf32>,
    %194 = vector.extract_strided_slice %188 {offsets = [0, 256], sizes = [8, 256], strides = [1, 1]} : vector<8x512xf32> to vector<8x256xf32>
    %c1_192 = arith.constant 1 : index
    %c0_193 = arith.constant 0 : index
    %c0_194 = arith.constant 0 : index
    %195 = vector.load %arg9[%c1_192, %c0_193, %c0_194] : memref<2x8x256xf32, #tpu.memory_space<vmem>>, vector<1x8x256xf32>
    %196 = vector.shape_cast %195 : vector<1x8x256xf32> to vector<8x256xf32>
    %197 = vector.shape_cast %194 : vector<8x256xf32> to vector<1x8x256xf32>
    tpu.vector_store %arg9[%c1_192, %c0_193, %c0_194], %197 {strides = array<i32>} : memref<2x8x256xf32, #tpu.memory_space<vmem>>, vector<1x8x256xf32>,
    %c5_i32 = arith.constant 5 : i32
    %198 = vector.broadcast %c5_i32 : i32 to vector<8x256xi32>
    %199 = arith.cmpi sge, %25, %198 : vector<8x256xi32>
    %c11_i32 = arith.constant 11 : i32
    %200 = vector.broadcast %c11_i32 : i32 to vector<8x256xi32>
    %201 = arith.cmpi slt, %25, %200 : vector<8x256xi32>
    %c0_195 = arith.constant 0 : index
    %c43 = arith.constant 43 : index
    %202 = vector.load %arg12[%c0_195, %c43] : memref<16x512xf32, #tpu.memory_space<vmem>>, vector<8x256xf32>
    %cst_196 = arith.constant 0.000000e+00 : f32
    %203 = vector.broadcast %cst_196 : f32 to vector<8x256xf32>
    %204 = arith.select %199, %202, %203 : vector<8x256xi1>, vector<8x256xf32>
    %c0_197 = arith.constant 0 : index
    %c0_198 = arith.constant 0 : index
    %205 = vector.load %arg13[%c0_197, %c0_198] : memref<72x512xf32, #tpu.memory_space<vmem>>, vector<8x256xf32>
    tpu.vector_store %arg13[%c0_197, %c0_198], %204 {strides = array<i32>} : memref<72x512xf32, #tpu.memory_space<vmem>>, vector<8x256xf32>,
    %c8_199 = arith.constant 8 : index
    %c43_200 = arith.constant 43 : index
    %206 = vector.load %arg12[%c8_199, %c43_200] : memref<16x512xf32, #tpu.memory_space<vmem>>, vector<8x256xf32>
    %cst_201 = arith.constant 0.000000e+00 : f32
    %207 = vector.broadcast %cst_201 : f32 to vector<8x256xf32>
    %208 = arith.select %199, %206, %207 : vector<8x256xi1>, vector<8x256xf32>
    %c0_202 = arith.constant 0 : index
    %c256_203 = arith.constant 256 : index
    %209 = vector.load %arg13[%c0_202, %c256_203] : memref<72x512xf32, #tpu.memory_space<vmem>>, vector<8x256xf32>
    tpu.vector_store %arg13[%c0_202, %c256_203], %208 {strides = array<i32>} : memref<72x512xf32, #tpu.memory_space<vmem>>, vector<8x256xf32>,
    %c0_204 = arith.constant 0 : index
    %c48_205 = arith.constant 48 : index
    %210 = vector.load %arg12[%c0_204, %c48_205] : memref<16x512xf32, #tpu.memory_space<vmem>>, vector<8x256xf32>
    %c8_206 = arith.constant 8 : index
    %c0_207 = arith.constant 0 : index
    %211 = vector.load %arg13[%c8_206, %c0_207] : memref<72x512xf32, #tpu.memory_space<vmem>>, vector<8x256xf32>
    tpu.vector_store %arg13[%c8_206, %c0_207], %210 {strides = array<i32>} : memref<72x512xf32, #tpu.memory_space<vmem>>, vector<8x256xf32>,
    %c8_208 = arith.constant 8 : index
    %c48_209 = arith.constant 48 : index
    %212 = vector.load %arg12[%c8_208, %c48_209] : memref<16x512xf32, #tpu.memory_space<vmem>>, vector<8x256xf32>
    %c8_210 = arith.constant 8 : index
    %c256_211 = arith.constant 256 : index
    %213 = vector.load %arg13[%c8_210, %c256_211] : memref<72x512xf32, #tpu.memory_space<vmem>>, vector<8x256xf32>
    tpu.vector_store %arg13[%c8_210, %c256_211], %212 {strides = array<i32>} : memref<72x512xf32, #tpu.memory_space<vmem>>, vector<8x256xf32>,
    %c0_212 = arith.constant 0 : index
    %c53 = arith.constant 53 : index
    %214 = vector.load %arg12[%c0_212, %c53] : memref<16x512xf32, #tpu.memory_space<vmem>>, vector<8x256xf32>
    %cst_213 = arith.constant 0.000000e+00 : f32
    %215 = vector.broadcast %cst_213 : f32 to vector<8x256xf32>
    %216 = arith.select %201, %214, %215 : vector<8x256xi1>, vector<8x256xf32>
    %c16_214 = arith.constant 16 : index
    %c0_215 = arith.constant 0 : index
    %217 = vector.load %arg13[%c16_214, %c0_215] : memref<72x512xf32, #tpu.memory_space<vmem>>, vector<8x256xf32>
    tpu.vector_store %arg13[%c16_214, %c0_215], %216 {strides = array<i32>} : memref<72x512xf32, #tpu.memory_space<vmem>>, vector<8x256xf32>,
    %c8_216 = arith.constant 8 : index
    %c53_217 = arith.constant 53 : index
    %218 = vector.load %arg12[%c8_216, %c53_217] : memref<16x512xf32, #tpu.memory_space<vmem>>, vector<8x256xf32>
    %cst_218 = arith.constant 0.000000e+00 : f32
    %219 = vector.broadcast %cst_218 : f32 to vector<8x256xf32>
    %220 = arith.select %201, %218, %219 : vector<8x256xi1>, vector<8x256xf32>
    %c16_219 = arith.constant 16 : index
    %c256_220 = arith.constant 256 : index
    %221 = vector.load %arg13[%c16_219, %c256_220] : memref<72x512xf32, #tpu.memory_space<vmem>>, vector<8x256xf32>
    tpu.vector_store %arg13[%c16_219, %c256_220], %220 {strides = array<i32>} : memref<72x512xf32, #tpu.memory_space<vmem>>, vector<8x256xf32>,
    %c0_221 = arith.constant 0 : index
    %c123 = arith.constant 123 : index
    %222 = vector.load %arg12[%c0_221, %c123] : memref<16x512xf32, #tpu.memory_space<vmem>>, vector<8x256xf32>
    %cst_222 = arith.constant 0.000000e+00 : f32
    %223 = vector.broadcast %cst_222 : f32 to vector<8x256xf32>
    %224 = arith.select %199, %222, %223 : vector<8x256xi1>, vector<8x256xf32>
    %c24_223 = arith.constant 24 : index
    %c0_224 = arith.constant 0 : index
    %225 = vector.load %arg13[%c24_223, %c0_224] : memref<72x512xf32, #tpu.memory_space<vmem>>, vector<8x256xf32>
    tpu.vector_store %arg13[%c24_223, %c0_224], %224 {strides = array<i32>} : memref<72x512xf32, #tpu.memory_space<vmem>>, vector<8x256xf32>,
    %c8_225 = arith.constant 8 : index
    %c123_226 = arith.constant 123 : index
    %226 = vector.load %arg12[%c8_225, %c123_226] : memref<16x512xf32, #tpu.memory_space<vmem>>, vector<8x256xf32>
    %cst_227 = arith.constant 0.000000e+00 : f32
    %227 = vector.broadcast %cst_227 : f32 to vector<8x256xf32>
    %228 = arith.select %199, %226, %227 : vector<8x256xi1>, vector<8x256xf32>
    %c24_228 = arith.constant 24 : index
    %c256_229 = arith.constant 256 : index
    %229 = vector.load %arg13[%c24_228, %c256_229] : memref<72x512xf32, #tpu.memory_space<vmem>>, vector<8x256xf32>
    tpu.vector_store %arg13[%c24_228, %c256_229], %228 {strides = array<i32>} : memref<72x512xf32, #tpu.memory_space<vmem>>, vector<8x256xf32>,
    %c0_230 = arith.constant 0 : index
    %c128_231 = arith.constant 128 : index
    %230 = vector.load %arg12[%c0_230, %c128_231] : memref<16x512xf32, #tpu.memory_space<vmem>>, vector<8x256xf32>
    %c32_232 = arith.constant 32 : index
    %c0_233 = arith.constant 0 : index
    %231 = vector.load %arg13[%c32_232, %c0_233] : memref<72x512xf32, #tpu.memory_space<vmem>>, vector<8x256xf32>
    tpu.vector_store %arg13[%c32_232, %c0_233], %230 {strides = array<i32>} : memref<72x512xf32, #tpu.memory_space<vmem>>, vector<8x256xf32>,
    %c8_234 = arith.constant 8 : index
    %c128_235 = arith.constant 128 : index
    %232 = vector.load %arg12[%c8_234, %c128_235] : memref<16x512xf32, #tpu.memory_space<vmem>>, vector<8x256xf32>
    %c32_236 = arith.constant 32 : index
    %c256_237 = arith.constant 256 : index
    %233 = vector.load %arg13[%c32_236, %c256_237] : memref<72x512xf32, #tpu.memory_space<vmem>>, vector<8x256xf32>
    tpu.vector_store %arg13[%c32_236, %c256_237], %232 {strides = array<i32>} : memref<72x512xf32, #tpu.memory_space<vmem>>, vector<8x256xf32>,
    %c0_238 = arith.constant 0 : index
    %c133 = arith.constant 133 : index
    %234 = vector.load %arg12[%c0_238, %c133] : memref<16x512xf32, #tpu.memory_space<vmem>>, vector<8x256xf32>
    %cst_239 = arith.constant 0.000000e+00 : f32
    %235 = vector.broadcast %cst_239 : f32 to vector<8x256xf32>
    %236 = arith.select %201, %234, %235 : vector<8x256xi1>, vector<8x256xf32>
    %c40_240 = arith.constant 40 : index
    %c0_241 = arith.constant 0 : index
    %237 = vector.load %arg13[%c40_240, %c0_241] : memref<72x512xf32, #tpu.memory_space<vmem>>, vector<8x256xf32>
    tpu.vector_store %arg13[%c40_240, %c0_241], %236 {strides = array<i32>} : memref<72x512xf32, #tpu.memory_space<vmem>>, vector<8x256xf32>,
    %c8_242 = arith.constant 8 : index
    %c133_243 = arith.constant 133 : index
    %238 = vector.load %arg12[%c8_242, %c133_243] : memref<16x512xf32, #tpu.memory_space<vmem>>, vector<8x256xf32>
    %cst_244 = arith.constant 0.000000e+00 : f32
    %239 = vector.broadcast %cst_244 : f32 to vector<8x256xf32>
    %240 = arith.select %201, %238, %239 : vector<8x256xi1>, vector<8x256xf32>
    %c40_245 = arith.constant 40 : index
    %c256_246 = arith.constant 256 : index
    %241 = vector.load %arg13[%c40_245, %c256_246] : memref<72x512xf32, #tpu.memory_space<vmem>>, vector<8x256xf32>
    tpu.vector_store %arg13[%c40_245, %c256_246], %240 {strides = array<i32>} : memref<72x512xf32, #tpu.memory_space<vmem>>, vector<8x256xf32>,
    %c0_247 = arith.constant 0 : index
    %c203 = arith.constant 203 : index
    %242 = vector.load %arg12[%c0_247, %c203] : memref<16x512xf32, #tpu.memory_space<vmem>>, vector<8x256xf32>
    %cst_248 = arith.constant 0.000000e+00 : f32
    %243 = vector.broadcast %cst_248 : f32 to vector<8x256xf32>
    %244 = arith.select %199, %242, %243 : vector<8x256xi1>, vector<8x256xf32>
    %c48_249 = arith.constant 48 : index
    %c0_250 = arith.constant 0 : index
    %245 = vector.load %arg13[%c48_249, %c0_250] : memref<72x512xf32, #tpu.memory_space<vmem>>, vector<8x256xf32>
    tpu.vector_store %arg13[%c48_249, %c0_250], %244 {strides = array<i32>} : memref<72x512xf32, #tpu.memory_space<vmem>>, vector<8x256xf32>,
    %c8_251 = arith.constant 8 : index
    %c203_252 = arith.constant 203 : index
    %246 = vector.load %arg12[%c8_251, %c203_252] : memref<16x512xf32, #tpu.memory_space<vmem>>, vector<8x256xf32>
    %cst_253 = arith.constant 0.000000e+00 : f32
    %247 = vector.broadcast %cst_253 : f32 to vector<8x256xf32>
    %248 = arith.select %199, %246, %247 : vector<8x256xi1>, vector<8x256xf32>
    %c48_254 = arith.constant 48 : index
    %c256_255 = arith.constant 256 : index
    %249 = vector.load %arg13[%c48_254, %c256_255] : memref<72x512xf32, #tpu.memory_space<vmem>>, vector<8x256xf32>
    tpu.vector_store %arg13[%c48_254, %c256_255], %248 {strides = array<i32>} : memref<72x512xf32, #tpu.memory_space<vmem>>, vector<8x256xf32>,
    %c0_256 = arith.constant 0 : index
    %c208 = arith.constant 208 : index
    %250 = vector.load %arg12[%c0_256, %c208] : memref<16x512xf32, #tpu.memory_space<vmem>>, vector<8x256xf32>
    %c56_257 = arith.constant 56 : index
    %c0_258 = arith.constant 0 : index
    %251 = vector.load %arg13[%c56_257, %c0_258] : memref<72x512xf32, #tpu.memory_space<vmem>>, vector<8x256xf32>
    tpu.vector_store %arg13[%c56_257, %c0_258], %250 {strides = array<i32>} : memref<72x512xf32, #tpu.memory_space<vmem>>, vector<8x256xf32>,
    %c8_259 = arith.constant 8 : index
    %c208_260 = arith.constant 208 : index
    %252 = vector.load %arg12[%c8_259, %c208_260] : memref<16x512xf32, #tpu.memory_space<vmem>>, vector<8x256xf32>
    %c56_261 = arith.constant 56 : index
    %c256_262 = arith.constant 256 : index
    %253 = vector.load %arg13[%c56_261, %c256_262] : memref<72x512xf32, #tpu.memory_space<vmem>>, vector<8x256xf32>
    tpu.vector_store %arg13[%c56_261, %c256_262], %252 {strides = array<i32>} : memref<72x512xf32, #tpu.memory_space<vmem>>, vector<8x256xf32>,
    %c0_263 = arith.constant 0 : index
    %c213 = arith.constant 213 : index
    %254 = vector.load %arg12[%c0_263, %c213] : memref<16x512xf32, #tpu.memory_space<vmem>>, vector<8x256xf32>
    %cst_264 = arith.constant 0.000000e+00 : f32
    %255 = vector.broadcast %cst_264 : f32 to vector<8x256xf32>
    %256 = arith.select %201, %254, %255 : vector<8x256xi1>, vector<8x256xf32>
    %c64_265 = arith.constant 64 : index
    %c0_266 = arith.constant 0 : index
    %257 = vector.load %arg13[%c64_265, %c0_266] : memref<72x512xf32, #tpu.memory_space<vmem>>, vector<8x256xf32>
    tpu.vector_store %arg13[%c64_265, %c0_266], %256 {strides = array<i32>} : memref<72x512xf32, #tpu.memory_space<vmem>>, vector<8x256xf32>,
    %c8_267 = arith.constant 8 : index
    %c213_268 = arith.constant 213 : index
    %258 = vector.load %arg12[%c8_267, %c213_268] : memref<16x512xf32, #tpu.memory_space<vmem>>, vector<8x256xf32>
    %cst_269 = arith.constant 0.000000e+00 : f32
    %259 = vector.broadcast %cst_269 : f32 to vector<8x256xf32>
    %260 = arith.select %201, %258, %259 : vector<8x256xi1>, vector<8x256xf32>
    %c64_270 = arith.constant 64 : index
    %c256_271 = arith.constant 256 : index
    %261 = vector.load %arg13[%c64_270, %c256_271] : memref<72x512xf32, #tpu.memory_space<vmem>>, vector<8x256xf32>
    tpu.vector_store %arg13[%c64_270, %c256_271], %260 {strides = array<i32>} : memref<72x512xf32, #tpu.memory_space<vmem>>, vector<8x256xf32>,
    %c2 = arith.constant 2 : index
    %c0_272 = arith.constant 0 : index
    %c0_273 = arith.constant 0 : index
    %262 = vector.load %arg2[%c2, %c0_272, %c0_273] : memref<3x8x72xf32, #tpu.memory_space<vmem>>, vector<1x8x72xf32>
    %263 = vector.shape_cast %262 : vector<1x8x72xf32> to vector<8x72xf32>
    %c0_274 = arith.constant 0 : index
    %c0_275 = arith.constant 0 : index
    %264 = vector.load %arg13[%c0_274, %c0_275] : memref<72x512xf32, #tpu.memory_space<vmem>>, vector<72x512xf32>
    %cst_276 = arith.constant dense<0.000000e+00> : vector<8x512xf32>
    %265 = tpu.matmul %263, %264, %cst_276 {dimension_numbers = #tpu.dot_dimension_numbers<[1], [0], [0], [1], [0, 0, 1, 1], [], []>} : vector<8x72xf32>, vector<72x512xf32>, vector<8x512xf32> -> vector<8x512xf32>
    %c2_277 = arith.constant 2 : index
    %c0_278 = arith.constant 0 : index
    %c0_279 = arith.constant 0 : index
    %266 = vector.load %arg3[%c2_277, %c0_278, %c0_279] : memref<3x8x1xf32, #tpu.memory_space<vmem>>, vector<1x8x1xf32>
    %267 = vector.shape_cast %266 : vector<1x8x1xf32> to vector<8x1xf32>
    %268 = vector.broadcast %267 : vector<8x1xf32> to vector<8x512xf32>
    %269 = arith.addf %265, %268 : vector<8x512xf32>
    %cst_280 = arith.constant 0.000000e+00 : f32
    %270 = vector.broadcast %cst_280 : f32 to vector<8x512xf32>
    %271 = arith.cmpf ogt, %269, %270 : vector<8x512xf32>
    %cst_281 = arith.constant 2.000000e-01 : f32
    %272 = vector.broadcast %cst_281 : f32 to vector<8x512xf32>
    %273 = arith.mulf %272, %269 : vector<8x512xf32>
    %274 = arith.select %271, %269, %273 : vector<8x512xi1>, vector<8x512xf32>
    %c16_282 = arith.constant 16 : index
    %c0_283 = arith.constant 0 : index
    %275 = vector.load %arg14[%c16_282, %c0_283] : memref<24x512xf32, #tpu.memory_space<vmem>>, vector<8x512xf32>
    tpu.vector_store %arg14[%c16_282, %c0_283], %274 {strides = array<i32>} : memref<24x512xf32, #tpu.memory_space<vmem>>, vector<8x512xf32>,
    %276 = vector.extract_strided_slice %274 {offsets = [0, 0], sizes = [8, 256], strides = [1, 1]} : vector<8x512xf32> to vector<8x256xf32>
    %c0_284 = arith.constant 0 : index
    %c0_285 = arith.constant 0 : index
    %c0_286 = arith.constant 0 : index
    %277 = vector.load %arg10[%c0_284, %c0_285, %c0_286] : memref<2x8x256xf32, #tpu.memory_space<vmem>>, vector<1x8x256xf32>
    %278 = vector.shape_cast %277 : vector<1x8x256xf32> to vector<8x256xf32>
    %279 = vector.shape_cast %276 : vector<8x256xf32> to vector<1x8x256xf32>
    tpu.vector_store %arg10[%c0_284, %c0_285, %c0_286], %279 {strides = array<i32>} : memref<2x8x256xf32, #tpu.memory_space<vmem>>, vector<1x8x256xf32>,
    %280 = vector.extract_strided_slice %274 {offsets = [0, 256], sizes = [8, 256], strides = [1, 1]} : vector<8x512xf32> to vector<8x256xf32>
    %c1_287 = arith.constant 1 : index
    %c0_288 = arith.constant 0 : index
    %c0_289 = arith.constant 0 : index
    %281 = vector.load %arg10[%c1_287, %c0_288, %c0_289] : memref<2x8x256xf32, #tpu.memory_space<vmem>>, vector<1x8x256xf32>
    %282 = vector.shape_cast %281 : vector<1x8x256xf32> to vector<8x256xf32>
    %283 = vector.shape_cast %280 : vector<8x256xf32> to vector<1x8x256xf32>
    tpu.vector_store %arg10[%c1_287, %c0_288, %c0_289], %283 {strides = array<i32>} : memref<2x8x256xf32, #tpu.memory_space<vmem>>, vector<1x8x256xf32>,
    %c0_290 = arith.constant 0 : index
    %c0_291 = arith.constant 0 : index
    %284 = vector.load %arg4[%c0_290, %c0_291] : memref<16x24xf32, #tpu.memory_space<vmem>>, vector<16x24xf32>
    %c0_292 = arith.constant 0 : index
    %c0_293 = arith.constant 0 : index
    %285 = vector.load %arg14[%c0_292, %c0_293] : memref<24x512xf32, #tpu.memory_space<vmem>>, vector<24x512xf32>
    %cst_294 = arith.constant dense<0.000000e+00> : vector<16x512xf32>
    %286 = tpu.matmul %284, %285, %cst_294 {dimension_numbers = #tpu.dot_dimension_numbers<[1], [0], [0], [1], [0, 0, 1, 1], [], []>} : vector<16x24xf32>, vector<24x512xf32>, vector<16x512xf32> -> vector<16x512xf32>
    %c0_295 = arith.constant 0 : index
    %c0_296 = arith.constant 0 : index
    %287 = vector.load %arg5[%c0_295, %c0_296] : memref<16x1xf32, #tpu.memory_space<vmem>>, vector<16x1xf32>
    %288 = vector.broadcast %287 : vector<16x1xf32> to vector<16x512xf32>
    %289 = arith.addf %286, %288 : vector<16x512xf32>
    %cst_297 = arith.constant 0.000000e+00 : f32
    %290 = vector.broadcast %cst_297 : f32 to vector<16x512xf32>
    %291 = arith.cmpf ogt, %289, %290 : vector<16x512xf32>
    %cst_298 = arith.constant 2.000000e-01 : f32
    %292 = vector.broadcast %cst_298 : f32 to vector<16x512xf32>
    %293 = arith.mulf %292, %289 : vector<16x512xf32>
    %294 = arith.select %291, %289, %293 : vector<16x512xi1>, vector<16x512xf32>
    %c0_299 = arith.constant 0 : index
    %c0_300 = arith.constant 0 : index
    %295 = vector.load %arg6[%c0_299, %c0_300] : memref<8x16xf32, #tpu.memory_space<vmem>>, vector<8x16xf32>
    %cst_301 = arith.constant dense<0.000000e+00> : vector<8x512xf32>
    %296 = tpu.matmul %295, %294, %cst_301 {dimension_numbers = #tpu.dot_dimension_numbers<[1], [0], [0], [1], [0, 0, 1, 1], [], []>} : vector<8x16xf32>, vector<16x512xf32>, vector<8x512xf32> -> vector<8x512xf32>
    %c0_302 = arith.constant 0 : index
    %c0_303 = arith.constant 0 : index
    %297 = vector.load %arg7[%c0_302, %c0_303] : memref<8x1xf32, #tpu.memory_space<vmem>>, vector<8x1xf32>
    %298 = vector.broadcast %297 : vector<8x1xf32> to vector<8x512xf32>
    %299 = arith.addf %296, %298 : vector<8x512xf32>
    %300 = vector.extract_strided_slice %299 {offsets = [0, 0], sizes = [8, 256], strides = [1, 1]} : vector<8x512xf32> to vector<8x256xf32>
    %c0_304 = arith.constant 0 : index
    %c0_305 = arith.constant 0 : index
    %c0_306 = arith.constant 0 : index
    %301 = vector.load %arg11[%c0_304, %c0_305, %c0_306] : memref<2x8x256xf32, #tpu.memory_space<vmem>>, vector<1x8x256xf32>
    %302 = vector.shape_cast %301 : vector<1x8x256xf32> to vector<8x256xf32>
    %303 = vector.shape_cast %300 : vector<8x256xf32> to vector<1x8x256xf32>
    tpu.vector_store %arg11[%c0_304, %c0_305, %c0_306], %303 {strides = array<i32>} : memref<2x8x256xf32, #tpu.memory_space<vmem>>, vector<1x8x256xf32>,
    %304 = vector.extract_strided_slice %299 {offsets = [0, 256], sizes = [8, 256], strides = [1, 1]} : vector<8x512xf32> to vector<8x256xf32>
    %c1_307 = arith.constant 1 : index
    %c0_308 = arith.constant 0 : index
    %c0_309 = arith.constant 0 : index
    %305 = vector.load %arg11[%c1_307, %c0_308, %c0_309] : memref<2x8x256xf32, #tpu.memory_space<vmem>>, vector<1x8x256xf32>
    %306 = vector.shape_cast %305 : vector<1x8x256xf32> to vector<8x256xf32>
    %307 = vector.shape_cast %304 : vector<8x256xf32> to vector<1x8x256xf32>
    tpu.vector_store %arg11[%c1_307, %c0_308, %c0_309], %307 {strides = array<i32>} : memref<2x8x256xf32, #tpu.memory_space<vmem>>, vector<1x8x256xf32>,
    return
  }
  func.func @transform_0(%arg0: i32) -> (i32, i32, i32) {
    %c0_i32 = arith.constant 0 : i32
    %c0_i32_0 = arith.constant 0 : i32
    %c0_i32_1 = arith.constant 0 : i32
    return %arg0, %c0_i32, %c0_i32_0 : i32, i32, i32
  }
  func.func @transform_1(%arg0: i32) -> (i32, i32, i32) {
    %c0_i32 = arith.constant 0 : i32
    %c0_i32_0 = arith.constant 0 : i32
    %c0_i32_1 = arith.constant 0 : i32
    %c0_i32_2 = arith.constant 0 : i32
    return %c0_i32, %c0_i32_0, %c0_i32_1 : i32, i32, i32
  }
  func.func @transform_2(%arg0: i32) -> (i32, i32, i32) {
    %c0_i32 = arith.constant 0 : i32
    %c0_i32_0 = arith.constant 0 : i32
    %c0_i32_1 = arith.constant 0 : i32
    %c0_i32_2 = arith.constant 0 : i32
    return %c0_i32, %c0_i32_0, %c0_i32_1 : i32, i32, i32
  }
  func.func @transform_3(%arg0: i32) -> (i32, i32) {
    %c0_i32 = arith.constant 0 : i32
    %c0_i32_0 = arith.constant 0 : i32
    %c0_i32_1 = arith.constant 0 : i32
    return %c0_i32, %c0_i32_0 : i32, i32
  }
  func.func @transform_4(%arg0: i32) -> (i32, i32) {
    %c0_i32 = arith.constant 0 : i32
    %c0_i32_0 = arith.constant 0 : i32
    %c0_i32_1 = arith.constant 0 : i32
    return %c0_i32, %c0_i32_0 : i32, i32
  }
  func.func @transform_5(%arg0: i32) -> (i32, i32) {
    %c0_i32 = arith.constant 0 : i32
    %c0_i32_0 = arith.constant 0 : i32
    %c0_i32_1 = arith.constant 0 : i32
    return %c0_i32, %c0_i32_0 : i32, i32
  }
  func.func @transform_6(%arg0: i32) -> (i32, i32) {
    %c0_i32 = arith.constant 0 : i32
    %c0_i32_0 = arith.constant 0 : i32
    %c0_i32_1 = arith.constant 0 : i32
    return %c0_i32, %c0_i32_0 : i32, i32
  }
  func.func @transform_7(%arg0: i32) -> (i32, i32, i32) {
    %c0_i32 = arith.constant 0 : i32
    %c0_i32_0 = arith.constant 0 : i32
    %c0_i32_1 = arith.constant 0 : i32
    return %arg0, %c0_i32, %c0_i32_0 : i32, i32, i32
  }
  func.func @transform_8(%arg0: i32) -> (i32, i32, i32) {
    %c0_i32 = arith.constant 0 : i32
    %c0_i32_0 = arith.constant 0 : i32
    %c0_i32_1 = arith.constant 0 : i32
    return %arg0, %c0_i32, %c0_i32_0 : i32, i32, i32
  }
  func.func @transform_9(%arg0: i32) -> (i32, i32, i32) {
    %c0_i32 = arith.constant 0 : i32
    %c0_i32_0 = arith.constant 0 : i32
    %c0_i32_1 = arith.constant 0 : i32
    return %arg0, %c0_i32, %c0_i32_0 : i32, i32, i32
  }
  func.func @transform_10(%arg0: i32) -> (i32, i32, i32) {
    %c0_i32 = arith.constant 0 : i32
    %c0_i32_0 = arith.constant 0 : i32
    %c0_i32_1 = arith.constant 0 : i32
    return %arg0, %c0_i32, %c0_i32_0 : i32, i32, i32
  }
}

</mosaic_0001>

<bundles_post_ra>
// kernel: tpu_custom_call.1
= control target key start
LH: loop header
LB: loop body
LE: loop exit
PB: predicated region body
PF: predicated region fallthrough
CT: control target
= control target key end

     0   :  { %16 = vsyncpa [#allocation6], 0  ;;  %s3516_s0 = inlined_call_operand.vmem [shape: f32[2,8,256], index: 0, kind: input, shape index: {}]   ;;  %s3517_s1 = inlined_call_operand.vmem [shape: f32[3,8,72], index: 1, kind: input, shape index: {}]   ;;  %s3518_s2 = inlined_call_operand.vmem [shape: f32[3,8,1], index: 2, kind: input, shape index: {}]   ;;  %s3519_s3 = inlined_call_operand.hbm [shape: f32[16,24], index: 3, kind: input, shape index: {}]   ;;  %s3520_s4 = inlined_call_operand.vmem [shape: f32[16,1], index: 4, kind: input, shape index: {}]   ;;  %s3521_s5 = inlined_call_operand.vmem [shape: f32[8,16], index: 5, kind: input, shape index: {}]   ;;  %s3522_s6 = inlined_call_operand.vmem [shape: f32[8,1], index: 6, kind: input, shape index: {}]   ;;  %s3523_s7 = inlined_call_operand.hbm [shape: f32[2,8,256], index: 7, kind: output, shape index: {0}]   ;;  %s3524_s8 = inlined_call_operand.hbm [shape: f32[2,8,256], index: 8, kind: output, shape index: {1}]   ;;  %s3525_s9 = inlined_call_operand.hbm [shape: f32[2,8,256], index: 9, kind: output, shape index: {2}]   ;;  %s3526_s10 = inlined_call_operand.hbm [shape: f32[2,8,256], index: 10, kind: output, shape index: {3}]  }
   0x1   :  { %17 = vsyncpa [#allocation7], 0 }
   0x2   :  { %18 = vsyncpa [#allocation10], 0 }
   0x3   :  { %19 = vsyncpa [#allocation13], 0  ;;  %s2882_s13 = smov [#allocation5]   ;;  %s2764_s17 = scalar_lea.hbm %s3519_s3, 256 }
   0x4   :  { %s31_s14 = sshll.u32 %s2882_s13, 4  ;;  %p2765_p0 = scmp.ne.s32.totalorder %s3519_s3, %s2764_s17  ;;  %s32_s14 = int_to_ptr.vmem [resolvable:$true] %s31_s14 }
   0x5   :  { %p2768_p1 = scmp.lt.u32.totalorder %s2764_s17, %s3519_s3 }
   0x7   :  { %p2770_p2 = pnand %p2768_p1, %p2765_p0 }
   0x9   :  { %2773 = shalt.err (!%p2770_p2)
}
   0xa   :  { %s2774_s22 = scalar_lea.vmem %s32_s14, 256  ;;  %p2779_p4 = scmp.lt.s32.totalorder %s32_s14, %s32_s14 }
   0xb   :  { %p2775_p3 = scmp.ne.s32.totalorder %s32_s14, %s2774_s22  ;;  %p2780_p5 = scmp.lt.s32.totalorder %s2774_s22, %s2774_s22 }
   0xd   :  { %p2781_p6 = por %p2780_p5, %p2779_p4 }
   0xf   :  { %p2782_p7 = pnand %p2781_p6, %p2775_p3 }
  0x11   :  { %2785 = shalt.err (!%p2782_p7)
}
  0x12   :  { %s2883_s23 = smov 128   ;;  %s2884_s24 = smov 8  }
  0x13   :  { %37 = dma.hbm_to_vmem [thread:$0]  %s3519_s3, 256, %s32_s14, [#allocation6], %s2883_s23, %s2883_s23, %s2884_s24  }
  0x14   :  { %2874 = dma.done.wait [#allocation6], 256  }
  0x15   :  { %2875 = vsyncadd [#allocation6], 4294967040  ;;  %v2885_v0 = vmov 0.0   ;;  %s2886_s27 = smov 16   ;;  %s2887_s28 = smov 17   ;;  %v2990_v1 = vld [vmem:[%s3516_s0] sm:$0xff]  ;;  %v60_v10 = vlaneseq }
  0x16   :  { %530 = vmatprep.mubr.f32.mxu0 %v2885_v0  ;;  %601 = vmatprep.mubr.f32.mxu1 %v2885_v0  ;;  %v2995_v2 = vld [vmem:[%s3516_s0 + $0x8] sm:$0xff]  ;;  %v3000_v3 = vld [vmem:[%s3516_s0 + $0x10] sm:$0xff]  ;;  %v3009_v5 = vld [vmem:[%s3516_s0 + $0x18] sm:$0xff]  ;;  %s2888_s16 = smov 15   ;;  %s2889_s17 = smov 1   ;;  %vm103_vm0 = vcmask 138240  }
  0x17   :  { %2434 = vrot.lane.b32.xlu1 %v2885_v0, %s2886_s27  ;;  %2429 = vrot.lane.b32.xlu0 %v2885_v0, %s2887_s28  ;;  %v3004_v4 = vpack.i.bf16 %v2995_v2, %v2990_v1  ;;  %v3016_v6 = vpack.i.bf16 %v3009_v5, %v3000_v3  ;;  %v3029_v7 = vpack.i.bf16 %v2885_v0, %v3009_v5  ;;  %s2890_s18 = smov 127   ;;  %s2891_s19 = smov 113   ;;  %v61_v11 = vand.u32 127, %v60_v10  ;;  %v2154_v34 = vld [vmem:[%s3518_s2 + $0x10] sm:$0xff]  ;;  %v1925_v40 = vld [vmem:[%s3522_s6] sm:$0xff] }
  0x18   :  { %v3033_v8 = vpack.i.bf16 %v2885_v0, %v2995_v2  ;;  %v3039_v9 = vpack.i.bf16 %v3000_v3, %v2990_v1  ;;  %s2892_s20 = smov 112   ;;  %s2893_s21 = smov 111   ;;  %vm144_vm1 = vcmask 130048   ;;  %vm2905_vm4 = vmmov 1  }
  0x19   :  { %s2894_s22 = smov 51   ;;  %s2895_s23 = smov 48   ;;  %v62_v12 = vadd.s32 128, %v61_v11  ;;  %v3094_v16 = vand.u32 15, %v61_v11  ;;  %vm181_vm7 = vcmask 121856   ;;  %vm222_vm8 = vcmask 7168  }
  0x1a   :  { %s2896_s24 = smov 45   ;;  %s2897_s25 = smov 3   ;;  %vm271_vm12 = vcmask 1039360   ;;  %vm312_vm15 = vcmask 924672  }
  0x1b   :  { %2449 = vrot.lane.b32.xlu1 %v3004_v4, %s2886_s27  ;;  %2439 = vrot.lane.b32.xlu0 %v3004_v4, %s2887_s28  ;;  %s2898_s26 = smov 125   ;;  %s2900_s29 = smov 80   ;;  %v3088_v15 = vand.u32 15, %v62_v12  ;;  %vm87_vm3 = vcmp.ge.s32.totalorder %v3094_v16, 1  ;;  %vm89_vm11 = vcmp.lt.s32.totalorder %v3094_v16, 15 }
  0x1c   :  { %s2901_s30 = smov 77   ;;  %s2902_s3 = smov 85   ;;  %vm3114_vm6 = vmpackc.low %vm2905_vm4, %vm87_vm3 }
  0x1d   :  { %s2903_s11 = smov 75   ;;  %vm88_vm2 = vcmp.ge.s32.totalorder %v3088_v15, 1  ;;  %s2904_s12 = smov 5   ;;  %vm90_vm9 = vcmp.lt.s32.totalorder %v3088_v15, 15  ;;  %vm2245_vm13 = vmpackc.low %vm87_vm3, %vm89_vm11  ;;  %vm390_vm3 = vcmask 908288  }
  0x1e   :  { %vm3107_vm5 = vmpackc.low %vm2905_vm4, %vm88_vm2  ;;  %s2906_s13 = smov 123   ;;  %s2907_s14 = smov 53  }
  0x1f   :  { %2454 = vrot.lane.b32.xlu1 %v3016_v6, %s2886_s27  ;;  %2444 = vrot.lane.b32.xlu0 %v3016_v6, %s2887_s28  ;;  %s2899_s28 = smov 83   ;;  %vm2242_vm10 = vmpackc.low %vm88_vm2, %vm90_vm9  ;;  %s2909_s15 = smov 43  }
  0x20   :  { %vm2248_vm14 = vmpackc.low %vm90_vm9, %vm2905_vm4 }
  0x21   :  { %vm2251_vm2 = vmpackc.low %vm89_vm11, %vm2905_vm4 }
  0x23   :  { %2464 = vrot.lane.b32.xlu1 %v3016_v6, %s2888_s16  ;;  %2459 = vrot.lane.b32.xlu0 %v3004_v4, %s2888_s16 }
  0x27   :  { %2474 = vrot.lane.b32.xlu1 %v3016_v6, %s2889_s17  ;;  %2469 = vrot.lane.b32.xlu0 %v3004_v4, %s2889_s17 }
  0x2b   :  { %2484 = vrot.lane.b32.xlu1 %v2885_v0, %s2889_s17  ;;  %2479 = vrot.lane.b32.xlu0 %v2885_v0, %s2888_s16 }
  0x2f   :  { %2494 = vrot.lane.b32.xlu1 %v3029_v7, %s2890_s18  ;;  %2489 = vrot.lane.b32.xlu0 %v3033_v8, %s2890_s18 }
  0x33   :  { %2504 = vrot.lane.b32.xlu1 %v3033_v8, %s2891_s19  ;;  %2499 = vrot.lane.b32.xlu0 %v3039_v9, %s2890_s18 }
  0x37   :  { %2514 = vrot.lane.b32.xlu1 %v3033_v8, %s2892_s20  ;;  %2509 = vrot.lane.b32.xlu0 %v3029_v7, %s2891_s19 }
  0x3b   :  { %2524 = vrot.lane.b32.xlu1 %v3039_v9, %s2891_s19  ;;  %2519 = vrot.lane.b32.xlu0 %v3029_v7, %s2892_s20  ;;  %s2910_s19 = smov [#allocation9]  }
  0x3f   :  { %386 = vrot.lane.b32.xlu1 %v2995_v2, %s2893_s21  ;;  %2529 = vrot.lane.b32.xlu0 %v3039_v9, %s2892_s20  ;;  %s2098_s20 = sshll.u32 %s2910_s19, 4  ;;  %s2099_s20 = int_to_ptr.vmem [resolvable:$true] %s2098_s20 }
  0x40   :  { %p2791_p9 = scmp.lt.s32.totalorder %s2099_s20, %s2099_s20 }
  0x43   :  { %407 = vrot.lane.b32.xlu1 %v3009_v5, %s2893_s21  ;;  %2534 = vrot.lane.b32.xlu0 %v2885_v0, %s2893_s21 }
  0x47   :  { %2544 = vrot.lane.b32.xlu1 %v3016_v6, %s2894_s22  ;;  %2539 = vrot.lane.b32.xlu0 %v3004_v4, %s2894_s22 }
  0x4b   :  { %2554 = vrot.lane.b32.xlu1 %v3016_v6, %s2895_s23  ;;  %2549 = vrot.lane.b32.xlu0 %v3004_v4, %s2895_s23 }
  0x4f   :  { %405 = vrot.lane.b32.xlu1 %v3000_v3, %s2893_s21  ;;  %384 = vrot.lane.b32.xlu0 %v2990_v1, %s2893_s21  ;;  %s2786_s21 = scalar_lea.vmem %s2099_s20, 512 }
  0x50   :  { %p2787_p8 = scmp.ne.s32.totalorder %s2099_s20, %s2786_s21  ;;  %p2792_p10 = scmp.lt.s32.totalorder %s2786_s21, %s2786_s21 }
  0x52   :  { %p2793_p11 = por %p2792_p10, %p2791_p9 }
  0x53   :  { %2564 = vrot.lane.b32.xlu1 %v2885_v0, %s2895_s23  ;;  %2559 = vrot.lane.b32.xlu0 %v2885_v0, %s2894_s22 }
  0x54   :  { %p2794_p12 = pnand %p2793_p11, %p2787_p8 }
  0x57   :  { %2574 = vrot.lane.b32.xlu1 %v3016_v6, %s2896_s24  ;;  %2569 = vrot.lane.b32.xlu0 %v3004_v4, %s2896_s24 }
  0x5b   :  { %2584 = vrot.lane.b32.xlu1 %v3016_v6, %s2897_s25  ;;  %2579 = vrot.lane.b32.xlu0 %v3004_v4, %s2897_s25 }
  0x5f   :  { %2594 = vrot.lane.b32.xlu1 %v2885_v0, %s2897_s25  ;;  %2589 = vrot.lane.b32.xlu0 %v2885_v0, %s2896_s24 }
  0x63   :  { %2604 = vrot.lane.b32.xlu1 %v3029_v7, %s2898_s26  ;;  %2599 = vrot.lane.b32.xlu0 %v3033_v8, %s2898_s26 }
  0x67   :  { %2614 = vrot.lane.b32.xlu1 %v3033_v8, %s2899_s28  ;;  %2609 = vrot.lane.b32.xlu0 %v3039_v9, %s2898_s26 }
  0x6b   :  { %2624 = vrot.lane.b32.xlu1 %v3033_v8, %s2900_s29  ;;  %2619 = vrot.lane.b32.xlu0 %v3029_v7, %s2899_s28 }
  0x6f   :  { %2634 = vrot.lane.b32.xlu1 %v3039_v9, %s2899_s28  ;;  %2629 = vrot.lane.b32.xlu0 %v3029_v7, %s2900_s29 }
  0x73   :  { %928 = vrot.lane.b32.xlu1 %v2995_v2, %s2901_s30  ;;  %2639 = vrot.lane.b32.xlu0 %v3039_v9, %s2900_s29 }
  0x77   :  { %949 = vrot.lane.b32.xlu1 %v3009_v5, %s2901_s30  ;;  %2644 = vrot.lane.b32.xlu0 %v2885_v0, %s2901_s30 }
  0x7b   :  { %2654 = vrot.lane.b32.xlu1 %v3016_v6, %s2902_s3  ;;  %2649 = vrot.lane.b32.xlu0 %v3004_v4, %s2902_s3 }
  0x7f   :  { %2664 = vrot.lane.b32.xlu1 %v3016_v6, %s2900_s29  ;;  %2659 = vrot.lane.b32.xlu0 %v3004_v4, %s2900_s29 }
  0x83   :  { %947 = vrot.lane.b32.xlu1 %v3000_v3, %s2901_s30  ;;  %926 = vrot.lane.b32.xlu0 %v2990_v1, %s2901_s30 }
  0x87   :  { %2674 = vrot.lane.b32.xlu1 %v2885_v0, %s2900_s29  ;;  %2669 = vrot.lane.b32.xlu0 %v2885_v0, %s2902_s3 }
  0x89   :  { %v2435_v13 = vpop.permute.xlu1 %2434  ;;  %v2430_v14 = vpop.permute.xlu0 %2429 }
  0x8a   :  { %v2436_v17 = vunpack.i.l.bf16 %v2435_v13  ;;  %v2431_v18 = vunpack.i.l.bf16 %v2430_v14  ;;  %v2437_v29 = vunpack.i.h.bf16 %v2435_v13  ;;  %v2432_v30 = vunpack.i.h.bf16 %v2430_v14 }
  0x8b   :  { %2684 = vrot.lane.b32.xlu1 %v3016_v6, %s2903_s11  ;;  %2679 = vrot.lane.b32.xlu0 %v3004_v4, %s2903_s11 }
  0x8d   :  { %v2450_v19 = vpop.permute.xlu1 %2449  ;;  %v2440_v20 = vpop.permute.xlu0 %2439 }
  0x8e   :  { %v2452_v21 = vunpack.i.h.bf16 %v2450_v19  ;;  %v2451_v22 = vunpack.i.l.bf16 %v2450_v19  ;;  %v2442_v23 = vunpack.i.h.bf16 %v2440_v20  ;;  %v2441_v24 = vunpack.i.l.bf16 %v2440_v20 }
  0x8f   :  { %2694 = vrot.lane.b32.xlu1 %v3016_v6, %s2904_s12  ;;  %2689 = vrot.lane.b32.xlu0 %v3004_v4, %s2904_s12 }
  0x90   :  { %v105_v25 = vsel %vm103_vm0, %v2441_v24, %v2442_v23  ;;  %v146_v26 = vsel %vm144_vm1, %v2451_v22, %v2452_v21  ;;  %v104_v27 = vsel %vm103_vm0, %v2431_v18, %v2441_v24  ;;  %v145_v28 = vsel %vm144_vm1, %v2436_v17, %v2451_v22 }
  0x91   :  { %v2455_v31 = vpop.permute.xlu1 %2454  ;;  %v2445_v32 = vpop.permute.xlu0 %2444  ;;  %v2235_v33 = vpack.c.bf16 %v146_v26, %v105_v25  ;;  %v2238_v35 = vpack.c.bf16 %v145_v28, %v104_v27 }
  0x92   :  { %v2457_v36 = vunpack.i.h.bf16 %v2455_v31  ;;  %v2456_v37 = vunpack.i.l.bf16 %v2455_v31  ;;  %v2447_v38 = vunpack.i.h.bf16 %v2445_v32  ;;  %v2446_v39 = vunpack.i.l.bf16 %v2445_v32 }
  0x93   :  { %2704 = vrot.lane.b32.xlu1 %v2885_v0, %s2904_s12  ;;  %2699 = vrot.lane.b32.xlu0 %v2885_v0, %s2903_s11 }
  0x94   :  { %2237 = vmatprep.subr.msk.bf16.mxu0 %vm3107_vm5, %v2235_v33  ;;  %v125_v41 = vsel %vm103_vm0, %v2446_v39, %v2447_v38  ;;  %v164_v42 = vsel %vm144_vm1, %v2456_v37, %v2457_v36  ;;  %v124_v43 = vsel %vm103_vm0, %v2432_v30, %v2446_v39  ;;  %v163_v44 = vsel %vm144_vm1, %v2437_v29, %v2456_v37 }
  0x95   :  { %2240 = vmatpush1.bf16.msk.msra.mxu0 %vm3114_vm6, %v2238_v35  ;;  %v2465_v45 = vpop.permute.xlu1 %2464  ;;  %v2460_v46 = vpop.permute.xlu0 %2459  ;;  %v2259_v47 = vpack.c.bf16 %v164_v42, %v125_v41  ;;  %v2262_v48 = vpack.c.bf16 %v163_v44, %v124_v43  ;;  %v2908_v35 = vmov 0   ;;  %vm353_vm0 = vcmask 916480  }
  0x96   :  { %v2467_v49 = vunpack.i.h.bf16 %v2465_v45  ;;  %v2466_v50 = vunpack.i.l.bf16 %v2465_v45  ;;  %v2462_v51 = vunpack.i.h.bf16 %v2460_v46  ;;  %v2461_v52 = vunpack.i.l.bf16 %v2460_v46  ;;  %2759 = vset.pattern.permute.xlu1 %v2908_v35  ;;  %2758 = vset.pattern.permute.xlu0 %v2908_v35 }
  0x97   :  { %2714 = vrot.lane.b32.xlu1 %v3029_v7, %s2906_s13  ;;  %2709 = vrot.lane.b32.xlu0 %v3033_v8, %s2906_s13 }
  0x98   :  { %2261 = vmatprep.subr.msk.bf16.mxu1 %vm3107_vm5, %v2259_v47  ;;  %v203_v59 = vsel %vm181_vm7, %v2466_v50, %v2467_v49  ;;  %v183_v60 = vsel %vm181_vm7, %v2461_v52, %v2462_v51 }
  0x99   :  { %2264 = vmatpush1.bf16.msk.msra.mxu1 %vm3114_vm6, %v2262_v48  ;;  %v2475_v53 = vpop.permute.xlu1 %2474  ;;  %v2470_v54 = vpop.permute.xlu0 %2469 }
  0x9a   :  { %v2477_v55 = vunpack.i.h.bf16 %v2475_v53  ;;  %v2476_v56 = vunpack.i.l.bf16 %v2475_v53  ;;  %v2472_v57 = vunpack.i.h.bf16 %v2470_v54  ;;  %v2471_v58 = vunpack.i.l.bf16 %v2470_v54 }
  0x9b   :  { %2724 = vrot.lane.b32.xlu1 %v3033_v8, %s2907_s14  ;;  %2719 = vrot.lane.b32.xlu0 %v3039_v9, %s2906_s13 }
  0x9c   :  { %v244_v61 = vsel %vm222_vm8, %v2476_v56, %v2477_v55  ;;  %v224_v62 = vsel %vm222_vm8, %v2471_v58, %v2472_v57 }
  0x9d   :  { %v2265_v63 = vpack.c.bf16 %v244_v61, %v203_v59  ;;  %v2241_v4 = vpack.c.bf16 %v224_v62, %v183_v60  ;;  %v2485_v6 = vpop.permute.xlu1 %2484  ;;  %v2480_v10 = vpop.permute.xlu0 %2479  ;;  %v2150_v60 = vld [vmem:[%s3518_s2 + $0x8] sm:$0xff] }
  0x9e   :  { %v2487_v11 = vunpack.i.h.bf16 %v2485_v6  ;;  %v2486_v12 = vunpack.i.l.bf16 %v2485_v6  ;;  %v2482_v13 = vunpack.i.h.bf16 %v2480_v10  ;;  %v2481_v14 = vunpack.i.l.bf16 %v2480_v10 }
  0x9f   :  { %2734 = vrot.lane.b32.xlu1 %v3033_v8, %s2895_s23  ;;  %2729 = vrot.lane.b32.xlu0 %v3029_v7, %s2907_s14 }
  0xa0   :  { %v223_v17 = vsel %vm222_vm8, %v2486_v12, %v2471_v58  ;;  %v243_v18 = vsel %vm222_vm8, %v2487_v11, %v2476_v56  ;;  %v202_v19 = vsel %vm181_vm7, %v2482_v13, %v2466_v50  ;;  %v182_v20 = vsel %vm181_vm7, %v2481_v14, %v2461_v52  ;;  %2243 = vmatprep.subr.msk.bf16.mxu0 %vm2242_vm10, %v2241_v4  ;;  %v456_v4 = vld [vmem:[%s3518_s2] sm:$0xff] }
  0xa1   :  { %v2268_v21 = vpack.c.bf16 %v243_v18, %v202_v19  ;;  %v2244_v22 = vpack.c.bf16 %v223_v17, %v182_v20  ;;  %2267 = vmatprep.subr.msk.bf16.mxu1 %vm2242_vm10, %v2265_v63  ;;  %v2495_v23 = vpop.permute.xlu1 %2494  ;;  %v2490_v24 = vpop.permute.xlu0 %2489  ;;  %vm630_vm7 = vcmp.ge.s32.totalorder %v3088_v15, 3  ;;  %vm629_vm10 = vcmp.ge.s32.totalorder %v3094_v16, 3 }
  0xa2   :  { %v2497_v8 = vunpack.i.h.bf16 %v2495_v23  ;;  %v2496_v25 = vunpack.i.l.bf16 %v2495_v23  ;;  %v2492_v26 = vunpack.i.h.bf16 %v2490_v24  ;;  %v2491_v27 = vunpack.i.l.bf16 %v2490_v24  ;;  %vm3238_vm8 = vmpackc.low %vm2905_vm4, %vm630_vm7 }
  0xa3   :  { %2744 = vrot.lane.b32.xlu1 %v3039_v9, %s2907_s14  ;;  %2739 = vrot.lane.b32.xlu0 %v3029_v7, %s2895_s23 }
  0xa4   :  { %v293_v28 = vsel %vm271_vm12, %v2496_v25, %v2497_v8  ;;  %v273_v29 = vsel %vm271_vm12, %v2491_v27, %v2492_v26  ;;  %2246 = vmatpush1.bf16.msk.msra.mxu0 %vm2245_vm13, %v2244_v22  ;;  %2270 = vmatpush1.bf16.msk.msra.mxu1 %vm2245_vm13, %v2268_v21  ;;  %v1727_v21 = vld [vmem:[%s3520_s4] sm:$0xff]  ;;  %vm764_vm13 = vcmask 23552  }
  0xa5   :  { %v2271_v30 = vpack.c.bf16 %v293_v28, %v3009_v5  ;;  %v2247_v31 = vpack.c.bf16 %v273_v29, %v2995_v2  ;;  %v2505_v32 = vpop.permute.xlu1 %2504  ;;  %v2500_v33 = vpop.permute.xlu0 %2499 }
  0xa6   :  { %v2502_v7 = vunpack.i.h.bf16 %v2500_v33  ;;  %v2501_v36 = vunpack.i.l.bf16 %v2500_v33  ;;  %v2507_v37 = vunpack.i.h.bf16 %v2505_v32  ;;  %v2506_v38 = vunpack.i.l.bf16 %v2505_v32 }
  0xa7   :  { %1469 = vrot.lane.b32.xlu1 %v2995_v2, %s2909_s15  ;;  %2749 = vrot.lane.b32.xlu0 %v3039_v9, %s2895_s23 }
  0xa8   :  { %v292_v39 = vsel %vm271_vm12, %v2502_v7, %v2496_v25  ;;  %v272_v41 = vsel %vm271_vm12, %v2501_v36, %v2491_v27  ;;  %2249 = vmatprep.subr.msk.bf16.mxu0 %vm2248_vm14, %v2247_v31  ;;  %2273 = vmatprep.subr.msk.bf16.mxu1 %vm2248_vm14, %v2271_v30  ;;  %v314_v47 = vsel %vm312_vm15, %v2506_v38, %v2507_v37  ;;  %v1728_v27 = vld [vmem:[%s3520_s4 + $0x8] sm:$0xff]  ;;  %vm723_vm12 = vcmask 367616  }
  0xa9   :  { %v2274_v42 = vpack.c.bf16 %v292_v39, %v3000_v3  ;;  %v2250_v43 = vpack.c.bf16 %v272_v41, %v2990_v1  ;;  %v2515_v44 = vpop.permute.xlu1 %2514  ;;  %v2510_v45 = vpop.permute.xlu0 %2509  ;;  %vm632_vm14 = vcmp.lt.s32.totalorder %v3088_v15, 13 }
  0xaa   :  { %v2517_v9 = vunpack.i.h.bf16 %v2515_v44  ;;  %v2516_v46 = vunpack.i.l.bf16 %v2515_v44  ;;  %v2512_v49 = vunpack.i.h.bf16 %v2510_v45  ;;  %v2511_v50 = vunpack.i.l.bf16 %v2510_v45 }
  0xab   :  { %1490 = vrot.lane.b32.xlu1 %v3009_v5, %s2909_s15  ;;  %2754 = vrot.lane.b32.xlu0 %v2885_v0, %s2909_s15 }
  0xac   :  { %v355_v48 = vsel %vm353_vm0, %v2516_v46, %v2517_v9  ;;  %2252 = vmatpush1.bf16.msk.msra.mxu0 %vm2251_vm2, %v2250_v43  ;;  %2276 = vmatpush1.bf16.msk.msra.mxu1 %vm2251_vm2, %v2274_v42  ;;  %v334_v56 = vsel %vm312_vm15, %v2511_v50, %v2512_v49  ;;  %v419_v49 = vld [vmem:[%s3517_s1] sm:$0xff] }
  0xad   :  { %v2253_v51 = vpack.c.bf16 %v355_v48, %v314_v47  ;;  %v2525_v52 = vpop.permute.xlu1 %2524  ;;  %v2520_v53 = vpop.permute.xlu0 %2519 }
  0xae   :  { %v2522_v54 = vunpack.i.h.bf16 %v2520_v53  ;;  %v2521_v55 = vunpack.i.l.bf16 %v2520_v53  ;;  %v2527_v57 = vunpack.i.h.bf16 %v2525_v52  ;;  %v2526_v58 = vunpack.i.l.bf16 %v2525_v52 }
  0xaf   :  { %1488 = vrot.lane.b32.xlu1 %v3000_v3, %s2909_s15  ;;  %1467 = vrot.lane.b32.xlu0 %v2990_v1, %s2909_s15 }
  0xb0   :  { %v373_v59 = vsel %vm353_vm0, %v2521_v55, %v2522_v54  ;;  %2255 = vmatprep.subr.msk.bf16.mxu0 %vm3107_vm5, %v2253_v51  ;;  %v313_v11 = vsel %vm312_vm15, %v2526_v58, %v2506_v38  ;;  %v333_v12 = vsel %vm312_vm15, %v2527_v57, %v2511_v50  ;;  %vm2290_vm15 = vmpackc.low %vm630_vm7, %vm632_vm14 }
  0xb1   :  { %v2277_v61 = vpack.c.bf16 %v373_v59, %v334_v56  ;;  %v387_v62 = vpop.permute.xlu1 %386  ;;  %v2530_v63 = vpop.permute.xlu0 %2529 }
  0xb2   :  { %v2532_v6 = vunpack.i.h.bf16 %v2530_v63  ;;  %v2531_v10 = vunpack.i.l.bf16 %v2530_v63 }
  0xb3   :  { %2279 = vmatprep.subr.msk.bf16.mxu1 %vm3107_vm5, %v2277_v61  ;;  %1003 = vperm.xlu1 %2759, %v2150_v60   ;;  %vm645_vm5 = vcmask 416768  }
  0xb4   :  { %v354_v13 = vsel %vm353_vm0, %v2531_v10, %v2516_v46  ;;  %v372_v14 = vsel %vm353_vm0, %v2532_v6, %v2521_v55  ;;  %459 = vperm.xlu0 %2758, %v456_v4   ;;  %vm631_vm0 = vcmp.lt.s32.totalorder %v3094_v16, 13 }
  0xb5   :  { %v2256_v17 = vpack.c.bf16 %v354_v13, %v313_v11  ;;  %v2280_v18 = vpack.c.bf16 %v372_v14, %v333_v12  ;;  %v408_v19 = vpop.permute.xlu1 %407  ;;  %v2535_v20 = vpop.permute.xlu0 %2534  ;;  %vm2293_vm2 = vmpackc.low %vm629_vm10, %vm631_vm0 }
  0xb6   :  { %v2537_v22 = vunpack.i.h.bf16 %v2535_v20  ;;  %v2536_v23 = vunpack.i.l.bf16 %v2535_v20  ;;  %vm2299_vm7 = vmpackc.low %vm631_vm0, %vm2905_vm4 }
  0xb7   :  { %2258 = vmatpush1.bf16.msk.msra.mxu0 %vm3114_vm6, %v2256_v17  ;;  %2282 = vmatpush1.bf16.msk.msra.mxu1 %vm3114_vm6, %v2280_v18  ;;  %vm686_vm6 = vcmask 392192  }
  0xb8   :  { %v392_v24 = vsel %vm390_vm3, %v387_v62, %v2536_v23  ;;  %v412_v8 = vsel %vm390_vm3, %v408_v19, %v2537_v22  ;;  %1544 = vperm.xlu1 %2759, %v2154_v34   ;;  %1731 = vperm.xlu0 %2758, %v1727_v21  }
  0xb9   :  { %v2545_v25 = vpop.permute.xlu1 %2544  ;;  %v2540_v26 = vpop.permute.xlu0 %2539  ;;  %2173 = vmatprep.subr.msk.mxu0 %vm90_vm9, %v392_v24  ;;  %2185 = vmatprep.subr.msk.mxu1 %vm90_vm9, %v412_v8  ;;  %vm462_vm9 = vcmask 588800  }
  0xba   :  { %v2547_v28 = vunpack.i.h.bf16 %v2545_v25  ;;  %v2546_v29 = vunpack.i.l.bf16 %v2545_v25  ;;  %v2542_v30 = vunpack.i.h.bf16 %v2540_v26  ;;  %v2541_v31 = vunpack.i.l.bf16 %v2540_v26 }
  0xbc   :  { %1736 = vperm.xlu1 %2759, %v1728_v27   ;;  %1928 = vperm.xlu0 %2758, %v1925_v40   ;;  %v667_v38 = vsel %vm645_vm5, %v2546_v29, %v2547_v28  ;;  %v647_v39 = vsel %vm645_vm5, %v2541_v31, %v2542_v30 }
  0xbd   :  { %v2555_v32 = vpop.permute.xlu1 %2554  ;;  %v2550_v33 = vpop.permute.xlu0 %2549 }
  0xbe   :  { %v2557_v35 = vunpack.i.h.bf16 %v2555_v32  ;;  %v2556_v7 = vunpack.i.l.bf16 %v2555_v32  ;;  %v2552_v36 = vunpack.i.h.bf16 %v2550_v33  ;;  %v2551_v37 = vunpack.i.l.bf16 %v2550_v33 }
  0xc0   :  { %v706_v41 = vsel %vm686_vm6, %v2556_v7, %v2557_v35  ;;  %v688_v42 = vsel %vm686_vm6, %v2551_v37, %v2552_v36 }
  0xc1   :  { %v2307_v43 = vpack.c.bf16 %v706_v41, %v667_v38  ;;  %v2283_v44 = vpack.c.bf16 %v688_v42, %v647_v39  ;;  %v406_v45 = vpop.permute.xlu1 %405  ;;  %v385_v9 = vpop.permute.xlu0 %384 }
  0xc2   :  { %v411_v47 = vsel %vm390_vm3, %v406_v45, %v408_v19  ;;  %v391_v48 = vsel %vm390_vm3, %v385_v9, %v387_v62  ;;  %vm813_vm3 = vcmask 1022976  }
  0xc3   :  { %2174 = vmatpush1.msk.msra.mxu0 %vm89_vm11, %v391_v48  ;;  %2186 = vmatpush1.msk.msra.mxu1 %vm89_vm11, %v411_v47  ;;  %vm3267_vm11 = vmpackc.low %vm2905_vm4, %vm629_vm10  ;;  %vm854_vm10 = vcmask 678912  }
  0xc4   :  { %2285 = vmatprep.subr.msk.bf16.mxu0 %vm3238_vm8, %v2283_v44  ;;  %2309 = vmatprep.subr.msk.bf16.mxu1 %vm3238_vm8, %v2307_v43 }
  0xc5   :  { %v2565_v50 = vpop.permute.xlu1 %2564  ;;  %v2560_v51 = vpop.permute.xlu0 %2559  ;;  %2147 = vmatmul.mubr.msk.f32.vlgmr.msra.gmra.mrb[0].mxu0 %vm462_vm9, %v419_v49  ;;  %2148 = vmatmul.mubr.msk.f32.vlgmr.msra.gmra.mrb[0].mxu1 %vm462_vm9, %v419_v49 }
  0xc6   :  { %v2567_v52 = vunpack.i.h.bf16 %v2565_v50  ;;  %v2566_v53 = vunpack.i.l.bf16 %v2565_v50  ;;  %v2562_v54 = vunpack.i.h.bf16 %v2560_v51  ;;  %v2561_v55 = vunpack.i.l.bf16 %v2560_v51  ;;  %1073 = vmatprep.mubr.f32.mxu0 %v2885_v0  ;;  %1144 = vmatprep.mubr.f32.mxu1 %v2885_v0 }
  0xc8   :  { %v687_v56 = vsel %vm686_vm6, %v2566_v53, %v2551_v37  ;;  %v705_v57 = vsel %vm686_vm6, %v2567_v52, %v2556_v7  ;;  %v666_v58 = vsel %vm645_vm5, %v2562_v54, %v2546_v29  ;;  %v646_v59 = vsel %vm645_vm5, %v2561_v55, %v2541_v31  ;;  %vm2296_vm5 = vmpackc.low %vm632_vm14, %vm2905_vm4 }
  0xc9   :  { %v2310_v61 = vpack.c.bf16 %v705_v57, %v666_v58  ;;  %v2286_v62 = vpack.c.bf16 %v687_v56, %v646_v59  ;;  %v2575_v63 = vpop.permute.xlu1 %2574  ;;  %v2570_v4 = vpop.permute.xlu0 %2569 }
  0xca   :  { %v2577_v6 = vunpack.i.h.bf16 %v2575_v63  ;;  %v2576_v10 = vunpack.i.l.bf16 %v2575_v63  ;;  %v2572_v11 = vunpack.i.h.bf16 %v2570_v4  ;;  %v2571_v12 = vunpack.i.l.bf16 %v2570_v4 }
  0xcb   :  { %2288 = vmatpush1.bf16.msk.msra.mxu0 %vm3267_vm11, %v2286_v62  ;;  %2312 = vmatpush1.bf16.msk.msra.mxu1 %vm3267_vm11, %v2310_v61 }
  0xcc   :  { %v745_v34 = vsel %vm723_vm12, %v2576_v10, %v2577_v6  ;;  %v725_v21 = vsel %vm723_vm12, %v2571_v12, %v2572_v11 }
  0xcd   :  { %v2585_v13 = vpop.permute.xlu1 %2584  ;;  %v2580_v14 = vpop.permute.xlu0 %2579 }
  0xce   :  { %v2587_v17 = vunpack.i.h.bf16 %v2585_v13  ;;  %v2586_v18 = vunpack.i.l.bf16 %v2585_v13  ;;  %v2582_v19 = vunpack.i.h.bf16 %v2580_v14  ;;  %v2581_v20 = vunpack.i.l.bf16 %v2580_v14 }
  0xd0   :  { %v786_v22 = vsel %vm764_vm13, %v2586_v18, %v2587_v17  ;;  %v766_v23 = vsel %vm764_vm13, %v2581_v20, %v2582_v19 }
  0xd1   :  { %v2313_v24 = vpack.c.bf16 %v786_v22, %v745_v34  ;;  %v2289_v8 = vpack.c.bf16 %v766_v23, %v725_v21  ;;  %v2595_v25 = vpop.permute.xlu1 %2594  ;;  %v2590_v26 = vpop.permute.xlu0 %2589 }
  0xd2   :  { %v2597_v27 = vunpack.i.h.bf16 %v2595_v25  ;;  %v2596_v40 = vunpack.i.l.bf16 %v2595_v25  ;;  %v2592_v28 = vunpack.i.h.bf16 %v2590_v26  ;;  %v2591_v29 = vunpack.i.l.bf16 %v2590_v26 }
  0xd3   :  { %2291 = vmatprep.subr.msk.bf16.mxu0 %vm2290_vm15, %v2289_v8  ;;  %2315 = vmatprep.subr.msk.bf16.mxu1 %vm2290_vm15, %v2313_v24  ;;  %vm1172_vm15 = vcmp.ge.s32.totalorder %v3094_v16, 5 }
  0xd4   :  { %v765_v30 = vsel %vm764_vm13, %v2596_v40, %v2581_v20  ;;  %v785_v31 = vsel %vm764_vm13, %v2597_v27, %v2586_v18  ;;  %v744_v32 = vsel %vm723_vm12, %v2592_v28, %v2576_v10  ;;  %v724_v33 = vsel %vm723_vm12, %v2591_v29, %v2571_v12 }
  0xd5   :  { %v2316_v35 = vpack.c.bf16 %v785_v31, %v744_v32  ;;  %v2292_v7 = vpack.c.bf16 %v765_v30, %v724_v33  ;;  %v2605_v36 = vpop.permute.xlu1 %2604  ;;  %v2600_v37 = vpop.permute.xlu0 %2599  ;;  %vm895_vm12 = vcmask 654336   ;;  %vm932_vm13 = vcmask 629760  }
  0xd6   :  { %v2607_v38 = vunpack.i.h.bf16 %v2605_v36  ;;  %v2606_v39 = vunpack.i.l.bf16 %v2605_v36  ;;  %v2602_v41 = vunpack.i.h.bf16 %v2600_v37  ;;  %v2601_v42 = vunpack.i.l.bf16 %v2600_v37 }
  0xd7   :  { %2294 = vmatpush1.bf16.msk.msra.mxu0 %vm2293_vm2, %v2292_v7  ;;  %2318 = vmatpush1.bf16.msk.msra.mxu1 %vm2293_vm2, %v2316_v35  ;;  %vm1265_vm2 = vcmask 613376  }
  0xd8   :  { %v835_v43 = vsel %vm813_vm3, %v2606_v39, %v2607_v38  ;;  %v815_v44 = vsel %vm813_vm3, %v2601_v42, %v2602_v41 }
  0xd9   :  { %v2319_v45 = vpack.c.bf16 %v835_v43, %v3009_v5  ;;  %v2295_v9 = vpack.c.bf16 %v815_v44, %v2995_v2  ;;  %v2615_v47 = vpop.permute.xlu1 %2614  ;;  %v2610_v48 = vpop.permute.xlu0 %2609 }
  0xda   :  { %v2612_v49 = vunpack.i.h.bf16 %v2610_v48  ;;  %v2611_v50 = vunpack.i.l.bf16 %v2610_v48  ;;  %v2617_v51 = vunpack.i.h.bf16 %v2615_v47  ;;  %v2616_v52 = vunpack.i.l.bf16 %v2615_v47 }
  0xdb   :  { %2297 = vmatprep.subr.msk.bf16.mxu0 %vm2296_vm5, %v2295_v9  ;;  %2321 = vmatprep.subr.msk.bf16.mxu1 %vm2296_vm5, %v2319_v45  ;;  %vm1175_vm5 = vcmp.lt.s32.totalorder %v3088_v15, 11 }
  0xdc   :  { %v834_v53 = vsel %vm813_vm3, %v2612_v49, %v2606_v39  ;;  %v814_v54 = vsel %vm813_vm3, %v2611_v50, %v2601_v42  ;;  %v856_v59 = vsel %vm854_vm10, %v2616_v52, %v2617_v51  ;;  %vm1306_vm3 = vcmask 39936  }
  0xdd   :  { %v2322_v5 = vpack.c.bf16 %v834_v53, %v3000_v3  ;;  %v2298_v2 = vpack.c.bf16 %v814_v54, %v2990_v1  ;;  %v2625_v55 = vpop.permute.xlu1 %2624  ;;  %v2620_v56 = vpop.permute.xlu0 %2619  ;;  %v2149_v53 = vld [vmem:[%s3517_s1 + $0x8] sm:$0xff] }
  0xde   :  { %v2627_v57 = vunpack.i.h.bf16 %v2625_v55  ;;  %v2626_v58 = vunpack.i.l.bf16 %v2625_v55  ;;  %v2622_v62 = vunpack.i.h.bf16 %v2620_v56  ;;  %v2621_v63 = vunpack.i.l.bf16 %v2620_v56 }
  0xdf   :  { %2300 = vmatpush1.bf16.msk.msra.mxu0 %vm2299_vm7, %v2298_v2  ;;  %2324 = vmatpush1.bf16.msk.msra.mxu1 %vm2299_vm7, %v2322_v5 }
  0xe0   :  { %v897_v61 = vsel %vm895_vm12, %v2626_v58, %v2627_v57  ;;  %v876_v1 = vsel %vm854_vm10, %v2621_v63, %v2622_v62 }
  0xe1   :  { %v2301_v4 = vpack.c.bf16 %v897_v61, %v856_v59  ;;  %v2635_v6 = vpop.permute.xlu1 %2634  ;;  %v2630_v10 = vpop.permute.xlu0 %2629 }
  0xe2   :  { %v2632_v11 = vunpack.i.h.bf16 %v2630_v10  ;;  %v2631_v3 = vunpack.i.l.bf16 %v2630_v10  ;;  %v2637_v12 = vunpack.i.h.bf16 %v2635_v6  ;;  %v2636_v13 = vunpack.i.l.bf16 %v2635_v6 }
  0xe3   :  { %2303 = vmatprep.subr.msk.bf16.mxu0 %vm3238_vm8, %v2301_v4 }
  0xe4   :  { %v915_v14 = vsel %vm895_vm12, %v2631_v3, %v2632_v11  ;;  %v855_v21 = vsel %vm854_vm10, %v2636_v13, %v2616_v52  ;;  %v875_v22 = vsel %vm854_vm10, %v2637_v12, %v2621_v63  ;;  %vm1174_vm10 = vcmp.lt.s32.totalorder %v3094_v16, 11 }
  0xe5   :  { %v2325_v17 = vpack.c.bf16 %v915_v14, %v876_v1  ;;  %v929_v18 = vpop.permute.xlu1 %928  ;;  %v2640_v19 = vpop.permute.xlu0 %2639 }
  0xe6   :  { %v2642_v20 = vunpack.i.h.bf16 %v2640_v19  ;;  %v2641_v34 = vunpack.i.l.bf16 %v2640_v19 }
  0xe7   :  { %2327 = vmatprep.subr.msk.bf16.mxu1 %vm3238_vm8, %v2325_v17  ;;  %vm1188_vm8 = vcmask 695296  }
  0xe8   :  { %v896_v23 = vsel %vm895_vm12, %v2641_v34, %v2626_v58  ;;  %v914_v24 = vsel %vm895_vm12, %v2642_v20, %v2631_v3 }
  0xe9   :  { %v2304_v8 = vpack.c.bf16 %v896_v23, %v855_v21  ;;  %v2328_v25 = vpack.c.bf16 %v914_v24, %v875_v22  ;;  %v950_v26 = vpop.permute.xlu1 %949  ;;  %v2645_v27 = vpop.permute.xlu0 %2644 }
  0xea   :  { %v2647_v40 = vunpack.i.h.bf16 %v2645_v27  ;;  %v2646_v28 = vunpack.i.l.bf16 %v2645_v27 }
  0xeb   :  { %2306 = vmatpush1.bf16.msk.msra.mxu0 %vm3267_vm11, %v2304_v8  ;;  %2330 = vmatpush1.bf16.msk.msra.mxu1 %vm3267_vm11, %v2328_v25  ;;  %vm1173_vm11 = vcmp.ge.s32.totalorder %v3088_v15, 5 }
  0xec   :  { %v934_v46 = vsel %vm932_vm13, %v929_v18, %v2646_v28  ;;  %v954_v29 = vsel %vm932_vm13, %v950_v26, %v2647_v40  ;;  %vm2338_vm7 = vmpackc.low %vm1173_vm11, %vm1175_vm5 }
  0xed   :  { %v2655_v30 = vpop.permute.xlu1 %2654  ;;  %v2650_v31 = vpop.permute.xlu0 %2649  ;;  %2197 = vmatprep.subr.msk.mxu0 %vm632_vm14, %v934_v46  ;;  %2209 = vmatprep.subr.msk.mxu1 %vm632_vm14, %v954_v29  ;;  %vm3337_vm14 = vmpackc.low %vm2905_vm4, %vm1173_vm11 }
  0xee   :  { %v2657_v32 = vunpack.i.h.bf16 %v2655_v30  ;;  %v2656_v33 = vunpack.i.l.bf16 %v2655_v30  ;;  %v2652_v35 = vunpack.i.h.bf16 %v2650_v31  ;;  %v2651_v7 = vunpack.i.l.bf16 %v2650_v31  ;;  %vm2347_vm11 = vmpackc.low %vm1174_vm10, %vm2905_vm4 }
  0xf0   :  { %v1210_v42 = vsel %vm1188_vm8, %v2656_v33, %v2657_v32  ;;  %v1190_v43 = vsel %vm1188_vm8, %v2651_v7, %v2652_v35 }
  0xf1   :  { %v2665_v36 = vpop.permute.xlu1 %2664  ;;  %v2660_v60 = vpop.permute.xlu0 %2659 }
  0xf2   :  { %v2667_v37 = vunpack.i.h.bf16 %v2665_v36  ;;  %v2666_v38 = vunpack.i.l.bf16 %v2665_v36  ;;  %v2662_v39 = vunpack.i.h.bf16 %v2660_v60  ;;  %v2661_v41 = vunpack.i.l.bf16 %v2660_v60 }
  0xf4   :  { %v1248_v44 = vsel %vm895_vm12, %v2666_v38, %v2667_v37  ;;  %v1230_v45 = vsel %vm895_vm12, %v2661_v41, %v2662_v39 }
  0xf5   :  { %v2355_v9 = vpack.c.bf16 %v1248_v44, %v1210_v42  ;;  %v2331_v47 = vpack.c.bf16 %v1230_v45, %v1190_v43  ;;  %v948_v48 = vpop.permute.xlu1 %947  ;;  %v927_v49 = vpop.permute.xlu0 %926  ;;  %v2760_v44 = vld [vmem:[%s3516_s0 + $0x18] sm:$0xff] }
  0xf6   :  { %v953_v51 = vsel %vm932_vm13, %v948_v48, %v950_v26  ;;  %v933_v52 = vsel %vm932_vm13, %v927_v49, %v929_v18  ;;  %vm1355_vm13 = vcmask 1006592  }
  0xf7   :  { %2198 = vmatpush1.msk.msra.mxu0 %vm631_vm0, %v933_v52  ;;  %2210 = vmatpush1.msk.msra.mxu1 %vm631_vm0, %v953_v51  ;;  %vm3366_vm0 = vmpackc.low %vm2905_vm4, %vm1172_vm15 }
  0xf8   :  { %2333 = vmatprep.subr.msk.bf16.mxu0 %vm3337_vm14, %v2331_v47  ;;  %2357 = vmatprep.subr.msk.bf16.mxu1 %vm3337_vm14, %v2355_v9  ;;  %v2761_v9 = vld [vmem:[%s3516_s0 + $0x8] sm:$0xff] }
  0xf9   :  { %v2675_v54 = vpop.permute.xlu1 %2674  ;;  %v2670_v5 = vpop.permute.xlu0 %2669  ;;  %2151 = vmatmul.mubr.msk.f32.vlgmr.msra.gmra.mrb[2].mxu0 %vm462_vm9, %v2149_v53  ;;  %2152 = vmatmul.mubr.msk.f32.vlgmr.msra.gmra.mrb[2].mxu1 %vm462_vm9, %v2149_v53 }
  0xfa   :  { %v2677_v2 = vunpack.i.h.bf16 %v2675_v54  ;;  %v2676_v55 = vunpack.i.l.bf16 %v2675_v54  ;;  %v2672_v56 = vunpack.i.h.bf16 %v2670_v5  ;;  %v2671_v57 = vunpack.i.l.bf16 %v2670_v5  ;;  %1614 = vmatprep.mubr.f32.mxu0 %v2885_v0  ;;  %1685 = vmatprep.mubr.f32.mxu1 %v2885_v0 }
  0xfc   :  { %v1229_v58 = vsel %vm895_vm12, %v2676_v55, %v2661_v41  ;;  %v1247_v59 = vsel %vm895_vm12, %v2677_v2, %v2666_v38  ;;  %v1209_v61 = vsel %vm1188_vm8, %v2672_v56, %v2656_v33  ;;  %v1189_v62 = vsel %vm1188_vm8, %v2671_v57, %v2651_v7  ;;  %vm2341_vm12 = vmpackc.low %vm1172_vm15, %vm1174_vm10  ;;  %v2762_v55 = vld [vmem:[%s3516_s0 + $0x10] sm:$0xff]  ;;  %v2763_v57 = vld [vmem:[%s3516_s0] sm:$0xff] }
  0xfd   :  { %v2358_v4 = vpack.c.bf16 %v1247_v59, %v1209_v61  ;;  %v2334_v6 = vpack.c.bf16 %v1229_v58, %v1189_v62  ;;  %v2685_v10 = vpop.permute.xlu1 %2684  ;;  %v2680_v11 = vpop.permute.xlu0 %2679  ;;  %vm2344_vm8 = vmpackc.low %vm1175_vm5, %vm2905_vm4  ;;  %vm1396_vm15 = vcmask 433152   ;;  %vm1473_vm4 = vcmask 351232  }
  0xfe   :  { %v2687_v3 = vunpack.i.h.bf16 %v2685_v10  ;;  %v2686_v1 = vunpack.i.l.bf16 %v2685_v10  ;;  %v2682_v12 = vunpack.i.h.bf16 %v2680_v11  ;;  %v2681_v13 = vunpack.i.l.bf16 %v2680_v11 }
  0xff   :  { %2336 = vmatpush1.bf16.msk.msra.mxu0 %vm3366_vm0, %v2334_v6  ;;  %2360 = vmatpush1.bf16.msk.msra.mxu1 %vm3366_vm0, %v2358_v4 }
 0x100   :  { %v1287_v21 = vsel %vm1265_vm2, %v2686_v1, %v2687_v3  ;;  %v1267_v22 = vsel %vm1265_vm2, %v2681_v13, %v2682_v12 }
 0x101   :  { %v2695_v14 = vpop.permute.xlu1 %2694  ;;  %v2690_v17 = vpop.permute.xlu0 %2689 }
 0x102   :  { %v2697_v18 = vunpack.i.h.bf16 %v2695_v14  ;;  %v2696_v19 = vunpack.i.l.bf16 %v2695_v14  ;;  %v2692_v20 = vunpack.i.h.bf16 %v2690_v17  ;;  %v2691_v34 = vunpack.i.l.bf16 %v2690_v17 }
 0x104   :  { %v1328_v23 = vsel %vm1306_vm3, %v2696_v19, %v2697_v18  ;;  %v1308_v24 = vsel %vm1306_vm3, %v2691_v34, %v2692_v20 }
 0x105   :  { %v2361_v8 = vpack.c.bf16 %v1328_v23, %v1287_v21  ;;  %v2337_v25 = vpack.c.bf16 %v1308_v24, %v1267_v22  ;;  %v2705_v26 = vpop.permute.xlu1 %2704  ;;  %v2700_v27 = vpop.permute.xlu0 %2699 }
 0x106   :  { %v2707_v40 = vunpack.i.h.bf16 %v2705_v26  ;;  %v2706_v28 = vunpack.i.l.bf16 %v2705_v26  ;;  %v2702_v46 = vunpack.i.h.bf16 %v2700_v27  ;;  %v2701_v29 = vunpack.i.l.bf16 %v2700_v27 }
 0x107   :  { %2339 = vmatprep.subr.msk.bf16.mxu0 %vm2338_vm7, %v2337_v25  ;;  %2363 = vmatprep.subr.msk.bf16.mxu1 %vm2338_vm7, %v2361_v8 }
 0x108   :  { %v1307_v30 = vsel %vm1306_vm3, %v2706_v28, %v2691_v34  ;;  %v1327_v31 = vsel %vm1306_vm3, %v2707_v40, %v2696_v19  ;;  %v1286_v32 = vsel %vm1265_vm2, %v2702_v46, %v2686_v1  ;;  %v1266_v33 = vsel %vm1265_vm2, %v2701_v29, %v2681_v13 }
 0x109   :  { %v2364_v35 = vpack.c.bf16 %v1327_v31, %v1286_v32  ;;  %v2340_v7 = vpack.c.bf16 %v1307_v30, %v1266_v33  ;;  %v2715_v36 = vpop.permute.xlu1 %2714  ;;  %v2710_v60 = vpop.permute.xlu0 %2709 }
 0x10a   :  { %v2717_v37 = vunpack.i.h.bf16 %v2715_v36  ;;  %v2716_v38 = vunpack.i.l.bf16 %v2715_v36  ;;  %v2712_v39 = vunpack.i.h.bf16 %v2710_v60  ;;  %v2711_v41 = vunpack.i.l.bf16 %v2710_v60  ;;  %v2153_v36 = vld [vmem:[%s3517_s1 + $0x10] sm:$0xff] }
 0x10b   :  { %2342 = vmatpush1.bf16.msk.msra.mxu0 %vm2341_vm12, %v2340_v7  ;;  %2366 = vmatpush1.bf16.msk.msra.mxu1 %vm2341_vm12, %v2364_v35 }
 0x10c   :  { %v1377_v42 = vsel %vm1355_vm13, %v2716_v38, %v2717_v37  ;;  %v1357_v43 = vsel %vm1355_vm13, %v2711_v41, %v2712_v39 }
 0x10d   :  { %v2367_v45 = vpack.c.bf16 %v1377_v42, %v2760_v44  ;;  %v2343_v47 = vpack.c.bf16 %v1357_v43, %v2761_v9  ;;  %v2725_v48 = vpop.permute.xlu1 %2724  ;;  %v2720_v49 = vpop.permute.xlu0 %2719 }
 0x10e   :  { %v2722_v51 = vunpack.i.h.bf16 %v2720_v49  ;;  %v2721_v52 = vunpack.i.l.bf16 %v2720_v49  ;;  %v2727_v53 = vunpack.i.h.bf16 %v2725_v48  ;;  %v2726_v54 = vunpack.i.l.bf16 %v2725_v48 }
 0x10f   :  { %2345 = vmatprep.subr.msk.bf16.mxu0 %vm2344_vm8, %v2343_v47  ;;  %2369 = vmatprep.subr.msk.bf16.mxu1 %vm2344_vm8, %v2367_v45 }
 0x110   :  { %v1376_v5 = vsel %vm1355_vm13, %v2722_v51, %v2716_v38  ;;  %v1356_v2 = vsel %vm1355_vm13, %v2721_v52, %v2711_v41  ;;  %v1398_v6 = vsel %vm1396_vm15, %v2726_v54, %v2727_v53 }
 0x111   :  { %v2370_v56 = vpack.c.bf16 %v1376_v5, %v2762_v55  ;;  %v2346_v58 = vpack.c.bf16 %v1356_v2, %v2763_v57  ;;  %v2735_v59 = vpop.permute.xlu1 %2734  ;;  %v2730_v61 = vpop.permute.xlu0 %2729 }
 0x112   :  { %v2737_v62 = vunpack.i.h.bf16 %v2735_v59  ;;  %v2736_v4 = vunpack.i.l.bf16 %v2735_v59  ;;  %v2732_v11 = vunpack.i.h.bf16 %v2730_v61  ;;  %v2731_v3 = vunpack.i.l.bf16 %v2730_v61 }
 0x113   :  { %2348 = vmatpush1.bf16.msk.msra.mxu0 %vm2347_vm11, %v2346_v58  ;;  %2372 = vmatpush1.bf16.msk.msra.mxu1 %vm2347_vm11, %v2370_v56  ;;  %vm1739_vm11 = vcmask 195584  }
 0x114   :  { %v1438_v10 = vsel %vm686_vm6, %v2736_v4, %v2737_v62  ;;  %v1418_v18 = vsel %vm1396_vm15, %v2731_v3, %v2732_v11 }
 0x115   :  { %v2349_v1 = vpack.c.bf16 %v1438_v10, %v1398_v6  ;;  %v2745_v12 = vpop.permute.xlu1 %2744  ;;  %v2740_v13 = vpop.permute.xlu0 %2739 }
 0x116   :  { %v2742_v14 = vunpack.i.h.bf16 %v2740_v13  ;;  %v2741_v17 = vunpack.i.l.bf16 %v2740_v13  ;;  %v2747_v19 = vunpack.i.h.bf16 %v2745_v12  ;;  %v2746_v20 = vunpack.i.l.bf16 %v2745_v12 }
 0x117   :  { %2351 = vmatprep.subr.msk.bf16.mxu0 %vm3337_vm14, %v2349_v1 }
 0x118   :  { %v1456_v34 = vsel %vm686_vm6, %v2741_v17, %v2742_v14  ;;  %v1397_v25 = vsel %vm1396_vm15, %v2746_v20, %v2726_v54  ;;  %v1417_v26 = vsel %vm1396_vm15, %v2747_v19, %v2731_v3 }
 0x119   :  { %v2373_v21 = vpack.c.bf16 %v1456_v34, %v1418_v18  ;;  %v1470_v22 = vpop.permute.xlu1 %1469  ;;  %v2750_v23 = vpop.permute.xlu0 %2749 }
 0x11a   :  { %v2752_v24 = vunpack.i.h.bf16 %v2750_v23  ;;  %v2751_v8 = vunpack.i.l.bf16 %v2750_v23 }
 0x11b   :  { %2375 = vmatprep.subr.msk.bf16.mxu1 %vm3337_vm14, %v2373_v21 }
 0x11c   :  { %v1437_v27 = vsel %vm686_vm6, %v2751_v8, %v2736_v4  ;;  %v1455_v40 = vsel %vm686_vm6, %v2752_v24, %v2741_v17 }
 0x11d   :  { %v2352_v28 = vpack.c.bf16 %v1437_v27, %v1397_v25  ;;  %v2376_v46 = vpack.c.bf16 %v1455_v40, %v1417_v26  ;;  %v1491_v29 = vpop.permute.xlu1 %1490  ;;  %v2755_v30 = vpop.permute.xlu0 %2754 }
 0x11e   :  { %v2757_v31 = vunpack.i.h.bf16 %v2755_v30  ;;  %v2756_v32 = vunpack.i.l.bf16 %v2755_v30 }
 0x11f   :  { %2354 = vmatpush1.bf16.msk.msra.mxu0 %vm3366_vm0, %v2352_v28  ;;  %2378 = vmatpush1.bf16.msk.msra.mxu1 %vm3366_vm0, %v2376_v46 }
 0x120   :  { %v1475_v50 = vsel %vm1473_vm4, %v1470_v22, %v2756_v32  ;;  %v1495_v33 = vsel %vm1473_vm4, %v1491_v29, %v2757_v31  ;;  %v1713_v32 = vld [vmem:[#allocation5] sm:$0xff] }
 0x121   :  { %v1489_v35 = vpop.permute.xlu1 %1488  ;;  %v1468_v7 = vpop.permute.xlu0 %1467  ;;  %2221 = vmatprep.subr.msk.mxu0 %vm1175_vm5, %v1475_v50  ;;  %2233 = vmatprep.subr.msk.mxu1 %vm1175_vm5, %v1495_v33  ;;  %v1714_v50 = vld [vmem:[#allocation5 + $0x8] sm:$0xff] }
 0x122   :  { %v1494_v60 = vsel %vm1473_vm4, %v1489_v35, %v1491_v29  ;;  %v1474_v37 = vsel %vm1473_vm4, %v1468_v7, %v1470_v22 }
 0x123   :  { %2222 = vmatpush1.msk.msra.mxu0 %vm1174_vm10, %v1474_v37  ;;  %2234 = vmatpush1.msk.msra.mxu1 %vm1174_vm10, %v1494_v60 }
 0x124   :  { %2155 = vmatmul.mubr.msk.f32.vlgmr.msra.gmra.mrb[4].mxu0 %vm462_vm9, %v2153_v36  ;;  %2156 = vmatmul.mubr.msk.f32.vlgmr.msra.gmra.mrb[4].mxu1 %vm462_vm9, %v2153_v36 }
 0x125   :  { %1810 = vmatprep.mubr.f32.mxu0 %v2885_v0  ;;  %1887 = vmatprep.mubr.f32.mxu1 %v2885_v0 }
 0x132   :  { %v1004_v54 = vpop.permute.xlu1 %1003 }
 0x133   :  { %v460_v15 = vpop.permute.xlu0 %459 }
 0x137   :  { %v1545_v19 = vpop.permute.xlu1 %1544  ;;  %v1732_v33 = vpop.permute.xlu0 %1731 }
 0x198   :  { %v532_v63 = vpop.f32.mrb[0].mxu0  ;;  %v603_v38 = vpop.f32.mrb[0].mxu1 }
 0x199   :  { %v534_v39 = vpop.f32.mrb[1].mxu0  ;;  %v605_v41 = vpop.f32.mrb[1].mxu1  ;;  %v533_v42 = vadd.f32 %v532_v63, %v460_v15  ;;  %v604_v43 = vadd.f32 %v603_v38, %v460_v15 }
 0x19a   :  { %v535_v44 = vadd.f32 %v534_v39, %v460_v15  ;;  %v606_v45 = vadd.f32 %v605_v41, %v460_v15 }
 0x19b   :  { %vm608_vm6 = vcmp.gt.f32.partialorder %v533_v42, 0.0  ;;  %vm610_vm14 = vcmp.gt.f32.partialorder %v604_v43, 0.0  ;;  %v612_v16 = vmul.f32 0.2, %v533_v42  ;;  %v614_v9 = vmul.f32 0.2, %v604_v43 }
 0x19c   :  { %vm609_vm0 = vcmp.gt.f32.partialorder %v535_v44, 0.0  ;;  %v613_v47 = vmul.f32 0.2, %v535_v44  ;;  %vm611_vm9 = vcmp.gt.f32.partialorder %v606_v45, 0.0  ;;  %v615_v48 = vmul.f32 0.2, %v606_v45 }
 0x19d   :  { %v616_v49 = vsel %vm608_vm6, %v533_v42, %v612_v16  ;;  %v618_v51 = vsel %vm610_vm14, %v604_v43, %v614_v9  ;;  %v1737_v42 = vpop.permute.xlu1 %1736 }
 0x19e   :  { %v617_v52 = vsel %vm609_vm0, %v535_v44, %v613_v47  ;;  %v619_v53 = vsel %vm611_vm9, %v606_v45, %v615_v48  ;;  %624 = vst [vmem:[#allocation8] sm:$0xff] %v616_v49  ;;  %627 = vst [vmem:[#allocation8 + $0x10] sm:$0xff] %v618_v51 }
 0x19f   :  { %625 = vst [vmem:[#allocation8 + $0x8] sm:$0xff] %v617_v52  ;;  %628 = vst [vmem:[#allocation8 + $0x18] sm:$0xff] %v619_v53 }
 0x1cc   :  { %v1075_v5 = vpop.f32.mrb[2].mxu0  ;;  %v1146_v2 = vpop.f32.mrb[2].mxu1 }
 0x1cd   :  { %v1076_v55 = vadd.f32 %v1075_v5, %v1004_v54  ;;  %v1147_v56 = vadd.f32 %v1146_v2, %v1004_v54  ;;  %v1077_v57 = vpop.f32.mrb[3].mxu0  ;;  %v1148_v58 = vpop.f32.mrb[3].mxu1 }
 0x1ce   :  { %v1078_v59 = vadd.f32 %v1077_v57, %v1004_v54  ;;  %v1149_v61 = vadd.f32 %v1148_v58, %v1004_v54 }
 0x1cf   :  { %vm1151_vm2 = vcmp.gt.f32.partialorder %v1076_v55, 0.0  ;;  %vm1153_vm3 = vcmp.gt.f32.partialorder %v1147_v56, 0.0  ;;  %v1155_v62 = vmul.f32 0.2, %v1076_v55  ;;  %v1157_v4 = vmul.f32 0.2, %v1147_v56 }
 0x1d0   :  { %vm1152_vm5 = vcmp.gt.f32.partialorder %v1078_v59, 0.0  ;;  %v1156_v6 = vmul.f32 0.2, %v1078_v59  ;;  %vm1154_vm7 = vcmp.gt.f32.partialorder %v1149_v61, 0.0  ;;  %v1158_v10 = vmul.f32 0.2, %v1149_v61 }
 0x1d1   :  { %v1159_v11 = vsel %vm1151_vm2, %v1076_v55, %v1155_v62  ;;  %v1161_v3 = vsel %vm1153_vm3, %v1147_v56, %v1157_v4 }
 0x1d2   :  { %v1160_v1 = vsel %vm1152_vm5, %v1078_v59, %v1156_v6  ;;  %v1162_v12 = vsel %vm1154_vm7, %v1149_v61, %v1158_v10  ;;  %1167 = vst [vmem:[#allocation9] sm:$0xff] %v1159_v11  ;;  %v2381_v13 = vpack.c.bf16 %v1159_v11, %v616_v49  ;;  %1170 = vst [vmem:[#allocation9 + $0x10] sm:$0xff] %v1161_v3 }
 0x1d3   :  { %v2385_v14 = vpack.c.bf16 %v1161_v3, %v618_v51  ;;  %1168 = vst [vmem:[#allocation9 + $0x8] sm:$0xff] %v1160_v1  ;;  %v2379_v17 = vpack.c.bf16 %v1160_v1, %v617_v52  ;;  %1171 = vst [vmem:[#allocation9 + $0x18] sm:$0xff] %v1162_v12  ;;  %v2383_v18 = vpack.c.bf16 %v1162_v12, %v619_v53  ;;  %v1924_v3 = vld [vmem:[%s3521_s5] sm:$0xff] }
 0x1d5   :  { %2380 = vmatprep.subr.bf16.mxu0 %v2379_v17  ;;  %2384 = vmatprep.subr.bf16.mxu1 %v2383_v18 }
 0x1d6   :  { %2382 = vmatpush1.bf16.msra.mxu0 %v2381_v13  ;;  %2386 = vmatpush1.bf16.msra.mxu1 %v2385_v14 }
 0x1f7   :  { %v1616_v20 = vpop.f32.mrb[4].mxu0  ;;  %v1687_v34 = vpop.f32.mrb[4].mxu1 }
 0x1f8   :  { %v1617_v21 = vadd.f32 %v1616_v20, %v1545_v19  ;;  %v1688_v22 = vadd.f32 %v1687_v34, %v1545_v19  ;;  %v1618_v23 = vpop.f32.mrb[5].mxu0  ;;  %v1689_v24 = vpop.f32.mrb[5].mxu1 }
 0x1f9   :  { %v1619_v8 = vadd.f32 %v1618_v23, %v1545_v19  ;;  %v1690_v25 = vadd.f32 %v1689_v24, %v1545_v19 }
 0x1fa   :  { %vm1692_vm10 = vcmp.gt.f32.partialorder %v1617_v21, 0.0  ;;  %v1696_v26 = vmul.f32 0.2, %v1617_v21  ;;  %vm1694_vm12 = vcmp.gt.f32.partialorder %v1688_v22, 0.0  ;;  %v1698_v27 = vmul.f32 0.2, %v1688_v22 }
 0x1fb   :  { %v1697_v40 = vmul.f32 0.2, %v1619_v8  ;;  %v1699_v28 = vmul.f32 0.2, %v1690_v25  ;;  %vm1693_vm13 = vcmp.gt.f32.partialorder %v1619_v8, 0.0  ;;  %vm1695_vm8 = vcmp.gt.f32.partialorder %v1690_v25, 0.0 }
 0x1fc   :  { %v1700_v46 = vsel %vm1692_vm10, %v1617_v21, %v1696_v26  ;;  %v1702_v29 = vsel %vm1694_vm12, %v1688_v22, %v1698_v27 }
 0x1fd   :  { %v1701_v30 = vsel %vm1693_vm13, %v1619_v8, %v1697_v40  ;;  %v1703_v31 = vsel %vm1695_vm8, %v1690_v25, %v1699_v28  ;;  %1708 = vst [vmem:[#allocation11] sm:$0xff] %v1700_v46  ;;  %1711 = vst [vmem:[#allocation11 + $0x10] sm:$0xff] %v1702_v29 }
 0x1fe   :  { %1709 = vst [vmem:[#allocation11 + $0x8] sm:$0xff] %v1701_v30  ;;  %1750 = vmatprep.subr.mxu0 %v1701_v30  ;;  %1712 = vst [vmem:[#allocation11 + $0x18] sm:$0xff] %v1703_v31  ;;  %1827 = vmatprep.subr.mxu1 %v1703_v31 }
 0x1ff   :  { %1751 = vmatpush1.msra.mxu0 %v1700_v46  ;;  %1828 = vmatpush1.msra.mxu1 %v1702_v29 }
 0x200   :  { %2157 = vmatmul.mubr.msk.f32.vlgmr.msra.gmra.mrb[6].mxu0 %vm1739_vm11, %v1713_v32  ;;  %2159 = vmatmul.mubr.msk.f32.vlgmr.msra.gmra.mrb[6].mxu1 %vm1739_vm11, %v1713_v32 }
 0x201   :  { %1816 = vmatprep.mubr.f32.mxu0 %v2885_v0  ;;  %1893 = vmatprep.mubr.f32.mxu1 %v2885_v0 }
 0x204   :  { %2158 = vmatmul.mubr.msk.f32.gmra.mrb[8].mxu0 %vm1739_vm11, %v1714_v50  ;;  %2160 = vmatmul.mubr.msk.f32.gmra.mrb[8].mxu1 %vm1739_vm11, %v1714_v50 }
 0x205   :  { %1998 = vmatprep.mubr.f32.mxu0 %v2885_v0  ;;  %2069 = vmatprep.mubr.f32.mxu1 %v2885_v0 }
 0x2d3   :  { %v1812_v35 = vpop.f32.mrb[6].mxu0  ;;  %v1889_v7 = vpop.f32.mrb[6].mxu1 }
 0x2d4   :  { %v1813_v36 = vadd.f32 %v1812_v35, %v1732_v33  ;;  %v1890_v60 = vadd.f32 %v1889_v7, %v1732_v33  ;;  %v1814_v37 = vpop.f32.mrb[7].mxu0  ;;  %v1891_v15 = vpop.f32.mrb[7].mxu1 }
 0x2d5   :  { %v1815_v63 = vadd.f32 %v1814_v37, %v1732_v33  ;;  %v1892_v38 = vadd.f32 %v1891_v15, %v1732_v33 }
 0x2d6   :  { %v1908_v39 = vmul.f32 0.2, %v1813_v36  ;;  %v1910_v41 = vmul.f32 0.2, %v1890_v60  ;;  %vm1900_vm15 = vcmp.gt.f32.partialorder %v1813_v36, 0.0  ;;  %vm1902_vm4 = vcmp.gt.f32.partialorder %v1890_v60, 0.0 }
 0x2d7   :  { %vm1901_vm6 = vcmp.gt.f32.partialorder %v1815_v63, 0.0  ;;  %v1909_v43 = vmul.f32 0.2, %v1815_v63  ;;  %v1818_v44 = vpop.f32.mrb[8].mxu0  ;;  %v1895_v45 = vpop.f32.mrb[8].mxu1  ;;  %vm1903_vm14 = vcmp.gt.f32.partialorder %v1892_v38, 0.0 }
 0x2d8   :  { %v1911_v0 = vmul.f32 0.2, %v1892_v38  ;;  %v1819_v16 = vadd.f32 %v1818_v44, %v1737_v42  ;;  %v1896_v9 = vadd.f32 %v1895_v45, %v1737_v42  ;;  %v1820_v47 = vpop.f32.mrb[9].mxu0  ;;  %v1897_v48 = vpop.f32.mrb[9].mxu1  ;;  %v1916_v49 = vsel %vm1900_vm15, %v1813_v36, %v1908_v39 }
 0x2d9   :  { %v1918_v51 = vsel %vm1902_vm4, %v1890_v60, %v1910_v41  ;;  %v1821_v52 = vadd.f32 %v1820_v47, %v1737_v42  ;;  %v1898_v53 = vadd.f32 %v1897_v48, %v1737_v42  ;;  %v1917_v58 = vsel %vm1901_vm6, %v1815_v63, %v1909_v43 }
 0x2da   :  { %vm1904_vm0 = vcmp.gt.f32.partialorder %v1819_v16, 0.0  ;;  %v1912_v54 = vmul.f32 0.2, %v1819_v16  ;;  %vm1906_vm9 = vcmp.gt.f32.partialorder %v1896_v9, 0.0  ;;  %v1914_v5 = vmul.f32 0.2, %v1896_v9 }
 0x2db   :  { %vm1905_vm2 = vcmp.gt.f32.partialorder %v1821_v52, 0.0  ;;  %v1913_v2 = vmul.f32 0.2, %v1821_v52  ;;  %vm1907_vm3 = vcmp.gt.f32.partialorder %v1898_v53, 0.0  ;;  %v1915_v55 = vmul.f32 0.2, %v1898_v53 }
 0x2dc   :  { %v1920_v56 = vsel %vm1904_vm0, %v1819_v16, %v1912_v54  ;;  %v1922_v57 = vsel %vm1906_vm9, %v1896_v9, %v1914_v5  ;;  %v1919_v59 = vsel %vm1903_vm14, %v1892_v38, %v1911_v0 }
 0x2dd   :  { %v2389_v61 = vpack.c.bf16 %v1920_v56, %v1916_v49  ;;  %v2393_v62 = vpack.c.bf16 %v1922_v57, %v1918_v51  ;;  %v1921_v4 = vsel %vm1905_vm2, %v1821_v52, %v1913_v2  ;;  %v1923_v6 = vsel %vm1907_vm3, %v1898_v53, %v1915_v55 }
 0x2de   :  { %v2387_v10 = vpack.c.bf16 %v1921_v4, %v1917_v58  ;;  %v2391_v11 = vpack.c.bf16 %v1923_v6, %v1919_v59 }
 0x2e0   :  { %2388 = vmatprep.subr.bf16.mxu0 %v2387_v10  ;;  %2392 = vmatprep.subr.bf16.mxu1 %v2391_v11 }
 0x2e1   :  { %2390 = vmatpush1.bf16.msra.mxu0 %v2389_v61  ;;  %2394 = vmatpush1.bf16.msra.mxu1 %v2393_v62 }
 0x2e4   :  { %2161 = vmatmul.mubr.msk.f32.vlgmr.msra.gmra.mrb[10].mxu0 %vm144_vm1, %v1924_v3  ;;  %2162 = vmatmul.mubr.msk.f32.vlgmr.msra.gmra.mrb[10].mxu1 %vm144_vm1, %v1924_v3 }
 0x2e5   :  { %2797 = shalt.err (!%p2794_p12)
}
 0x2e6   :  { %s2798_s2 = scalar_lea.hbm %s3524_s8, 512 }
 0x2e7   :  { %p2799_p13 = scmp.ne.s32.totalorder %s3524_s8, %s2798_s2  ;;  %p2802_p0 = scmp.lt.u32.totalorder %s2798_s2, %s3524_s8 }
 0x2e9   :  { %p2804_p1 = pnand %p2802_p0, %p2799_p13 }
 0x2eb   :  { %2807 = shalt.err (!%p2804_p1)
}
 0x2ec   :  { %s2911_s4 = smov 256   ;;  %s2912_s29 = smov [#allocation8]  }
 0x2ed   :  { %2104 = dma.vmem_to_hbm [thread:$0]  %s2099_s20, 512, %s3524_s8, [#allocation10], %s2911_s4, %s2911_s4, %s2886_s27  }
 0x2ee   :  { %s2086_s30 = sshll.u32 %s2912_s29, 4  ;;  %s2913_s3 = smov [#allocation11]   ;;  %s2087_s30 = int_to_ptr.vmem [resolvable:$true] %s2086_s30 }
 0x2ef   :  { %s2110_s11 = sshll.u32 %s2913_s3, 4  ;;  %s2808_s12 = scalar_lea.vmem %s2087_s30, 512  ;;  %s2111_s11 = int_to_ptr.vmem [resolvable:$true] %s2110_s11 }
 0x2f0   :  { %p2809_p2 = scmp.ne.s32.totalorder %s2087_s30, %s2808_s12  ;;  %p2813_p3 = scmp.lt.s32.totalorder %s2087_s30, %s2087_s30 }
 0x2f1   :  { %p2814_p4 = scmp.lt.s32.totalorder %s2808_s12, %s2808_s12 }
 0x2f3   :  { %p2815_p5 = por %p2814_p4, %p2813_p3 }
 0x2f5   :  { %p2816_p6 = pnand %p2815_p5, %p2809_p2 }
 0x2f7   :  { %2819 = shalt.err (!%p2816_p6)
}
 0x2f8   :  { %s2820_s15 = scalar_lea.hbm %s3523_s7, 512 }
 0x2f9   :  { %p2821_p7 = scmp.ne.s32.totalorder %s3523_s7, %s2820_s15  ;;  %p2824_p8 = scmp.lt.u32.totalorder %s2820_s15, %s3523_s7 }
 0x2fb   :  { %p2826_p9 = pnand %p2824_p8, %p2821_p7 }
 0x2fd   :  { %2829 = shalt.err (!%p2826_p9)
}
 0x2fe   :  { %2092 = dma.vmem_to_hbm [thread:$0]  %s2087_s30, 512, %s3523_s7, [#allocation7], %s2911_s4, %s2911_s4, %s2886_s27  }
 0x2ff   :  { %s2830_s19 = scalar_lea.vmem %s2111_s11, 512  ;;  %p2835_p11 = scmp.lt.s32.totalorder %s2111_s11, %s2111_s11 }
 0x300   :  { %p2831_p10 = scmp.ne.s32.totalorder %s2111_s11, %s2830_s19  ;;  %p2836_p12 = scmp.lt.s32.totalorder %s2830_s19, %s2830_s19 }
 0x302   :  { %p2837_p13 = por %p2836_p12, %p2835_p11 }
 0x304   :  { %p2838_p0 = pnand %p2837_p13, %p2831_p10 }
 0x306   :  { %2841 = shalt.err (!%p2838_p0)
}
 0x307   :  { %s2842_s22 = scalar_lea.hbm %s3525_s9, 512 }
 0x308   :  { %p2843_p1 = scmp.ne.s32.totalorder %s3525_s9, %s2842_s22  ;;  %p2846_p2 = scmp.lt.u32.totalorder %s2842_s22, %s3525_s9 }
 0x30a   :  { %p2848_p3 = pnand %p2846_p2, %p2843_p1 }
 0x30c   :  { %2851 = shalt.err (!%p2848_p3)
}
 0x30d   :  { %2116 = dma.vmem_to_hbm [thread:$0]  %s2111_s11, 512, %s3525_s9, [#allocation10], %s2911_s4, %s2911_s4, %s2886_s27   ;;  %v1929_v1 = vpop.permute.xlu0 %1928 }
 0x30e   :  { %s2914_s26 = smov [#allocation12]  }
 0x30f   :  { %s2122_s6 = sshll.u32 %s2914_s26, 4  ;;  %s2123_s6 = int_to_ptr.vmem [resolvable:$true] %s2122_s6 }
 0x310   :  { %s2852_s28 = scalar_lea.vmem %s2123_s6, 512  ;;  %p2857_p5 = scmp.lt.s32.totalorder %s2123_s6, %s2123_s6 }
 0x311   :  { %p2853_p4 = scmp.ne.s32.totalorder %s2123_s6, %s2852_s28  ;;  %p2858_p6 = scmp.lt.s32.totalorder %s2852_s28, %s2852_s28 }
 0x313   :  { %p2859_p7 = por %p2858_p6, %p2857_p5 }
 0x315   :  { %p2860_p8 = pnand %p2859_p7, %p2853_p4 }
 0x3b7   :  { %v2000_v12 = vpop.f32.mrb[10].mxu0  ;;  %v2071_v13 = vpop.f32.mrb[10].mxu1 }
 0x3b8   :  { %v2001_v14 = vadd.f32 %v2000_v12, %v1929_v1  ;;  %v2072_v17 = vadd.f32 %v2071_v13, %v1929_v1  ;;  %v2002_v18 = vpop.f32.mrb[11].mxu0  ;;  %v2073_v19 = vpop.f32.mrb[11].mxu1 }
 0x3b9   :  { %v2003_v20 = vadd.f32 %v2002_v18, %v1929_v1  ;;  %v2074_v34 = vadd.f32 %v2073_v19, %v1929_v1 }
 0x3ba   :  { %2076 = vst [vmem:[#allocation12] sm:$0xff] %v2001_v14  ;;  %2079 = vst [vmem:[#allocation12 + $0x10] sm:$0xff] %v2072_v17 }
 0x3bb   :  { %2077 = vst [vmem:[#allocation12 + $0x8] sm:$0xff] %v2003_v20  ;;  %2080 = vst [vmem:[#allocation12 + $0x18] sm:$0xff] %v2074_v34 }
 0x3bc   :  { %2863 = shalt.err (!%p2860_p8)
}
 0x3bd   :  { %s2864_s30 = scalar_lea.hbm %s3526_s10, 512 }
 0x3be   :  { %p2865_p9 = scmp.ne.s32.totalorder %s3526_s10, %s2864_s30  ;;  %p2868_p10 = scmp.lt.u32.totalorder %s2864_s30, %s3526_s10 }
 0x3c0   :  { %p2870_p11 = pnand %p2868_p10, %p2865_p9 }
 0x3c2   :  { %2873 = shalt.err (!%p2870_p11)
}
 0x3c3   :  { %2128 = dma.vmem_to_hbm [thread:$0]  %s2123_s6, 512, %s3526_s10, [#allocation13], %s2911_s4, %s2911_s4, %s2886_s27  }
 0x3c4   :  { %2876 = dma.done.wait [#allocation7], 512  }
 0x3c5   :  { %2877 = vsyncadd [#allocation7], 4294966784 }
 0x3c6   :  { %2878 = dma.done.wait [#allocation10], 1024  }
 0x3c7   :  { %2879 = vsyncadd [#allocation10], 4294966272 }
 0x3c8   :  { %2880 = dma.done.wait [#allocation13], 512  }
 0x3c9   :  { %2881 = vsyncadd [#allocation13], 4294966784 }
 0x3ca   :  { %2141 = vsyncpa [#allocation6], 1 }
 0x3cb   :  { %2142 = vsyncpa [#allocation7], 1 }
 0x3cc   :  { %2143 = vsyncpa [#allocation10], 1 }
 0x3cd   :  { %2144 = vsyncpa [#allocation13], 1 }

</bundles_post_ra>
